<compile_context>
chip_gen: v6e
topology: v6e:2x2x1
jax: 0.10.0
libtpu: 0.0.40
codegen_flags: <defaults>
</compile_context>

<pallas_src>
import functools

import jax
import jax.numpy as jnp
from jax import lax
from jax.experimental import pallas as pl
from jax.experimental.pallas import tpu as pltpu


_HIGHEST = jax.lax.Precision.HIGHEST


# ---------------------------------------------------------------------------
# Fused Pallas kernel: (folded) embedding -> 3x LSTM cell (1 step) -> linear
# ---------------------------------------------------------------------------

def _fused_forward_kernel(tok_ref, h0_ref, c0_ref, *rest,
                          n_layers, hidden_size):
    # rest layout:
    #   [w_0, b_0, ..., w_{L-1}, b_{L-1}, w_lin, b_lin,   (inputs)
    #    logits_ref, hn_ref, cn_ref]                      (outputs)
    layer_refs = rest[:2 * n_layers]
    wlin_ref, blin_ref = rest[2 * n_layers: 2 * n_layers + 2]
    logits_ref, hn_ref, cn_ref = rest[2 * n_layers + 2:]

    H = hidden_size
    B = tok_ref.shape[0]
    # Layer 0's stacked weight is (V + H, 4H) with the embedding pre-folded in.
    V = layer_refs[0].shape[0] - H

    # ---- Layer-0 "input" is the exact one-hot token matrix ----------------
    # (embedding lookup + x @ W_ih0^T were folded into w_0 at init time).
    tok = tok_ref[...]                                        # (B, 1) int32
    vocab_ids = lax.broadcasted_iota(jnp.int32, (B, V), 1)    # (B, V)
    x = (vocab_ids == tok).astype(jnp.float32)                # (B, V) one-hot

    # ---- Stacked LSTM layers, single timestep, PyTorch gate order i,f,g,o --
    for l in range(n_layers):
        w_ref = layer_refs[2 * l]       # (in + H, 4H): [W_x^T ; W_hh^T]
        b_ref = layer_refs[2 * l + 1]   # (1, 4H)     : b_ih + b_hh
        in_dim = w_ref.shape[0] - H     # V for layer 0, H afterwards (mult of 8)

        h = h0_ref[l]                   # (B, H)
        c = c0_ref[l]                   # (B, H)

        # Two dots against sublane-aligned static weight slices — no lane
        # concat of activations, no xh materialization.
        gates = (jnp.dot(x, w_ref[:in_dim, :],
                         preferred_element_type=jnp.float32,
                         precision=_HIGHEST)
                 + jnp.dot(h, w_ref[in_dim:, :],
                           preferred_element_type=jnp.float32,
                           precision=_HIGHEST)
                 + b_ref[...])                                # (B, 4H)

        # Two full-width transcendentals over the (B, 4H = 128-lane) tile,
        # then static lane slices for the individual gates.
        sig = jax.nn.sigmoid(gates)
        tnh = jnp.tanh(gates)
        i_g = sig[:, 0 * H:1 * H]
        f_g = sig[:, 1 * H:2 * H]
        g_g = tnh[:, 2 * H:3 * H]
        o_g = sig[:, 3 * H:4 * H]

        c_new = f_g * c + i_g * g_g
        h_new = o_g * jnp.tanh(c_new)

        hn_ref[l] = h_new               # write straight into stacked outputs
        cn_ref[l] = c_new
        x = h_new
        # TODO(synk): nn.LSTM inter-layer dropout (p=0.2) is a train-mode-only
        # stochastic op; eval/deterministic semantics (identity) are used here.

    # ---- Linear head ------------------------------------------------------
    logits_ref[...] = (jnp.dot(x, wlin_ref[...],
                               preferred_element_type=jnp.float32,
                               precision=_HIGHEST)
                       + blin_ref[...])


def _vmem_spec():
    return pl.BlockSpec(memory_space=pltpu.MemorySpace.VMEM)


# ---------------------------------------------------------------------------
# Model (parameters + forward)
# ---------------------------------------------------------------------------

def init_params(key, vocabs_size, hidden_size, output_size,
                embedding_dimension, n_layers):
    """PyTorch-style init: embedding ~ N(0,1); LSTM/Linear ~ U(-k, k), k=1/sqrt(H).

    Stores both reference-form weights (w_{l}_t: [W_ih^T ; W_hh^T]) and the
    kernel-form weights (w_{l}_k), where the layer-0 kernel weight has the
    embedding table pre-folded in:  onehot @ (E @ W_ih^T) == (onehot @ E) @ W_ih^T.
    """
    params = {}
    k = 1.0 / jnp.sqrt(jnp.float32(hidden_size))
    keys = jax.random.split(key, 1 + 4 * n_layers + 2)
    it = iter(keys)

    emb = jax.random.normal(
        next(it), (vocabs_size, embedding_dimension), jnp.float32)
    params['embedding'] = emb

    for l in range(n_layers):
        in_features = embedding_dimension if l == 0 else hidden_size
        w_ih = jax.random.uniform(next(it), (4 * hidden_size, in_features),
                                  jnp.float32, -k, k)
        w_hh = jax.random.uniform(next(it), (4 * hidden_size, hidden_size),
                                  jnp.float32, -k, k)
        b_ih = jax.random.uniform(next(it), (4 * hidden_size,),
                                  jnp.float32, -k, k)
        b_hh = jax.random.uniform(next(it), (4 * hidden_size,),
                                  jnp.float32, -k, k)

        w_t = jnp.concatenate([w_ih.T, w_hh.T], axis=0)        # (in+H, 4H)
        params[f'w_{l}_t'] = w_t                               # reference form
        params[f'b_{l}'] = (b_ih + b_hh)[None, :]              # (1, 4H)

        if l == 0:
            # Fold embedding into layer-0's input weight (done ONCE, f32 HIGHEST).
            w0_x = jnp.dot(emb, w_ih.T, precision=_HIGHEST)    # (V, 4H)
            params['w_0_k'] = jnp.concatenate([w0_x, w_hh.T], axis=0)  # (V+H, 4H)
        else:
            params[f'w_{l}_k'] = w_t

    w_lin = jax.random.uniform(next(it), (output_size, hidden_size),
                               jnp.float32, -k, k)
    b_lin = jax.random.uniform(next(it), (output_size,),
                               jnp.float32, -k, k)
    params['w_lin_t'] = w_lin.T                                # (H, O)
    params['b_lin'] = b_lin[None, :]                           # (1, O)
    return params


def init_hidden(n_layers, batch_size, hidden_size):
    h = jnp.zeros((n_layers, batch_size, hidden_size), jnp.float32)
    c = jnp.zeros((n_layers, batch_size, hidden_size), jnp.float32)
    return (h, c)


def generative_model_forward(params, input_tokens, hidden, *, n_layers):
    """Mirrors generative_model.forward(input, hidden).

    input_tokens: (batch,) int32 token ids
    hidden: tuple of (n_layers, batch, hidden) arrays
    returns: (logits (batch, output_size), (h_n, c_n))
    """
    h0, c0 = hidden
    B = input_tokens.shape[0]
    L = n_layers
    H = h0.shape[-1]
    O = params['w_lin_t'].shape[1]

    tok = input_tokens.reshape(B, 1).astype(jnp.int32)

    weight_args = []
    for l in range(L):
        weight_args.append(params[f'w_{l}_k'])
        weight_args.append(params[f'b_{l}'])

    n_inputs = 3 + 2 * L + 2  # tok, h0, c0, per-layer (w, b), w_lin, b_lin

    logits, h_n, c_n = pl.pallas_call(
        functools.partial(_fused_forward_kernel,
                          n_layers=L, hidden_size=H),
        out_shape=(jax.ShapeDtypeStruct((B, O), jnp.float32),
                   jax.ShapeDtypeStruct((L, B, H), jnp.float32),
                   jax.ShapeDtypeStruct((L, B, H), jnp.float32)),
        in_specs=[_vmem_spec() for _ in range(n_inputs)],
        out_specs=(_vmem_spec(), _vmem_spec(), _vmem_spec()),
        # Recurrent state is fully overwritten -> reuse its HBM buffers.
        input_output_aliases={1: 1, 2: 2},
    )(tok, h0, c0, *weight_args, params['w_lin_t'], params['b_lin'])

    return logits, (h_n, c_n)


# ---------------------------------------------------------------------------
# Pure-JAX reference (PyTorch semantics: gather -> LSTM -> linear)
# ---------------------------------------------------------------------------

def reference_forward(params, input_tokens, hidden, *, n_layers):
    h0, c0 = hidden
    H = h0.shape[-1]
    x = jnp.take(params['embedding'], input_tokens, axis=0)
    hs, cs = [], []
    for l in range(n_layers):
        xh = jnp.concatenate([x, h0[l]], axis=1)
        gates = jnp.dot(xh, params[f'w_{l}_t'], precision=_HIGHEST) + params[f'b_{l}']
        i = jax.nn.sigmoid(gates[:, 0 * H:1 * H])
        f = jax.nn.sigmoid(gates[:, 1 * H:2 * H])
        g = jnp.tanh(gates[:, 2 * H:3 * H])
        o = jax.nn.sigmoid(gates[:, 3 * H:4 * H])
        c_new = f * c0[l] + i * g
        h_new = o * jnp.tanh(c_new)
        hs.append(h_new)
        cs.append(c_new)
        x = h_new
    logits = jnp.dot(x, params['w_lin_t'], precision=_HIGHEST) + params['b_lin']
    return logits, (jnp.stack(hs, axis=0), jnp.stack(cs, axis=0))


# ---------------------------------------------------------------------------
# Main
# ---------------------------------------------------------------------------

if __name__ == "__main__":
    # Small shapes consistent with the module's forward (seq_len == 1).
    batch_size = 8
    vocabs_size = 32
    embedding_dimension = 16
    hidden_size = 32
    output_size = vocabs_size
    n_layers = 3

    key = jax.random.PRNGKey(0)
    pkey, ikey = jax.random.split(key)

    params = init_params(pkey, vocabs_size, hidden_size, output_size,
                         embedding_dimension, n_layers)
    input_tokens = jax.random.randint(ikey, (batch_size,), 0, vocabs_size,
                                      dtype=jnp.int32)
    hidden = init_hidden(n_layers, batch_size, hidden_size)

    # Reference first (the hidden-state args are donated to the Pallas call).
    ref_logits, (ref_h, ref_c) = reference_forward(
        params, input_tokens, hidden, n_layers=n_layers)
    jax.block_until_ready((ref_logits, ref_h, ref_c))

    fwd = jax.jit(functools.partial(generative_model_forward, n_layers=n_layers),
                  donate_argnums=(2,))
    logits, (h_n, c_n) = fwd(params, input_tokens, hidden)
    jax.block_until_ready((logits, h_n, c_n))

    assert logits.shape == (batch_size, output_size)
    assert h_n.shape == (n_layers, batch_size, hidden_size)
    assert c_n.shape == (n_layers, batch_size, hidden_size)

    # With precision=HIGHEST everywhere, the only mismatch sources are fp
    # reassociation from the embedding fold and tiny EUP-vs-XLA transcendental
    # differences -> tight tolerance.
    assert bool(jnp.allclose(logits, ref_logits, atol=1e-4, rtol=1e-4))
    assert bool(jnp.allclose(h_n, ref_h, atol=1e-4, rtol=1e-4))
    assert bool(jnp.allclose(c_n, ref_c, atol=1e-4, rtol=1e-4))

    print("KERNEL_OK")
</pallas_src>

<mosaic_0001>
module attributes {stable_mosaic.version = 11 : i64} {
  func.func @_fused_forward_kernel(%arg0: memref<8x1xi32, #tpu.memory_space<vmem>>, %arg1: memref<3x8x32xf32, #tpu.memory_space<vmem>>, %arg2: memref<3x8x32xf32, #tpu.memory_space<vmem>>, %arg3: memref<64x128xf32, #tpu.memory_space<vmem>>, %arg4: memref<1x128xf32, #tpu.memory_space<vmem>>, %arg5: memref<64x128xf32, #tpu.memory_space<vmem>>, %arg6: memref<1x128xf32, #tpu.memory_space<vmem>>, %arg7: memref<64x128xf32, #tpu.memory_space<vmem>>, %arg8: memref<1x128xf32, #tpu.memory_space<vmem>>, %arg9: memref<32x32xf32, #tpu.memory_space<vmem>>, %arg10: memref<1x32xf32, #tpu.memory_space<vmem>>, %arg11: memref<8x32xf32, #tpu.memory_space<vmem>>, %arg12: memref<3x8x32xf32, #tpu.memory_space<vmem>>, %arg13: memref<3x8x32xf32, #tpu.memory_space<vmem>>) attributes {dimension_semantics = [], scalar_prefetch = 0 : i64, scratch_operands = 0 : i64, tpu.core_type = #tpu.core_type<tc>} {
    %c0 = arith.constant 0 : index
    %c0_0 = arith.constant 0 : index
    %0 = vector.load %arg0[%c0, %c0_0] : memref<8x1xi32, #tpu.memory_space<vmem>>, vector<8x1xi32>
    %1 = tpu.iota {dimensions = array<i32: 1>} : vector<8x32xi32>
    %2 = vector.broadcast %0 : vector<8x1xi32> to vector<8x32xi32>
    %3 = arith.cmpi eq, %1, %2 : vector<8x32xi32>
    %4 = arith.extui %3 : vector<8x32xi1> to vector<8x32xi32>
    %5 = arith.sitofp %4 : vector<8x32xi32> to vector<8x32xf32>
    %c0_1 = arith.constant 0 : index
    %c0_2 = arith.constant 0 : index
    %c0_3 = arith.constant 0 : index
    %6 = vector.load %arg1[%c0_1, %c0_2, %c0_3] : memref<3x8x32xf32, #tpu.memory_space<vmem>>, vector<1x8x32xf32>
    %7 = vector.shape_cast %6 : vector<1x8x32xf32> to vector<8x32xf32>
    %c0_4 = arith.constant 0 : index
    %c0_5 = arith.constant 0 : index
    %c0_6 = arith.constant 0 : index
    %8 = vector.load %arg2[%c0_4, %c0_5, %c0_6] : memref<3x8x32xf32, #tpu.memory_space<vmem>>, vector<1x8x32xf32>
    %9 = vector.shape_cast %8 : vector<1x8x32xf32> to vector<8x32xf32>
    %c0_7 = arith.constant 0 : index
    %c0_8 = arith.constant 0 : index
    %10 = vector.load %arg3[%c0_7, %c0_8] : memref<64x128xf32, #tpu.memory_space<vmem>>, vector<32x128xf32>
    %cst = arith.constant dense<0.000000e+00> : vector<8x128xf32>
    %11 = tpu.matmul %5, %10, %cst {dimension_numbers = #tpu.dot_dimension_numbers<[1], [0], [0], [1], [0, 0, 1, 1], [], []>, precision = #tpu.contract_precision<fp32>} : vector<8x32xf32>, vector<32x128xf32>, vector<8x128xf32> -> vector<8x128xf32>
    %c32 = arith.constant 32 : index
    %c0_9 = arith.constant 0 : index
    %12 = vector.load %arg3[%c32, %c0_9] : memref<64x128xf32, #tpu.memory_space<vmem>>, vector<32x128xf32>
    %cst_10 = arith.constant dense<0.000000e+00> : vector<8x128xf32>
    %13 = tpu.matmul %7, %12, %cst_10 {dimension_numbers = #tpu.dot_dimension_numbers<[1], [0], [0], [1], [0, 0, 1, 1], [], []>, precision = #tpu.contract_precision<fp32>} : vector<8x32xf32>, vector<32x128xf32>, vector<8x128xf32> -> vector<8x128xf32>
    %14 = arith.addf %11, %13 : vector<8x128xf32>
    %c0_11 = arith.constant 0 : index
    %c0_12 = arith.constant 0 : index
    %15 = vector.load %arg4[%c0_11, %c0_12] : memref<1x128xf32, #tpu.memory_space<vmem>>, vector<1x128xf32>
    %16 = vector.broadcast %15 : vector<1x128xf32> to vector<8x128xf32>
    %17 = arith.addf %14, %16 : vector<8x128xf32>
    %18 = arith.negf %17 : vector<8x128xf32>
    %19 = math.exp %18 : vector<8x128xf32>
    %cst_13 = arith.constant 1.000000e+00 : f32
    %20 = vector.broadcast %cst_13 : f32 to vector<8x128xf32>
    %21 = arith.addf %20, %19 : vector<8x128xf32>
    %22 = arith.divf %20, %21 : vector<8x128xf32>
    %23 = math.tanh %17 : vector<8x128xf32>
    %24 = vector.extract_strided_slice %22 {offsets = [0, 0], sizes = [8, 32], strides = [1, 1]} : vector<8x128xf32> to vector<8x32xf32>
    %25 = vector.extract_strided_slice %22 {offsets = [0, 32], sizes = [8, 32], strides = [1, 1]} : vector<8x128xf32> to vector<8x32xf32>
    %26 = vector.extract_strided_slice %23 {offsets = [0, 64], sizes = [8, 32], strides = [1, 1]} : vector<8x128xf32> to vector<8x32xf32>
    %27 = vector.extract_strided_slice %22 {offsets = [0, 96], sizes = [8, 32], strides = [1, 1]} : vector<8x128xf32> to vector<8x32xf32>
    %28 = arith.mulf %25, %9 : vector<8x32xf32>
    %29 = arith.mulf %24, %26 : vector<8x32xf32>
    %30 = arith.addf %28, %29 : vector<8x32xf32>
    %31 = math.tanh %30 : vector<8x32xf32>
    %32 = arith.mulf %27, %31 : vector<8x32xf32>
    %c0_14 = arith.constant 0 : index
    %c0_15 = arith.constant 0 : index
    %c0_16 = arith.constant 0 : index
    %33 = vector.load %arg12[%c0_14, %c0_15, %c0_16] : memref<3x8x32xf32, #tpu.memory_space<vmem>>, vector<1x8x32xf32>
    %34 = vector.shape_cast %33 : vector<1x8x32xf32> to vector<8x32xf32>
    %35 = vector.shape_cast %32 : vector<8x32xf32> to vector<1x8x32xf32>
    tpu.vector_store %arg12[%c0_14, %c0_15, %c0_16], %35 {strides = array<i32>} : memref<3x8x32xf32, #tpu.memory_space<vmem>>, vector<1x8x32xf32>,
    %c0_17 = arith.constant 0 : index
    %c0_18 = arith.constant 0 : index
    %c0_19 = arith.constant 0 : index
    %36 = vector.load %arg13[%c0_17, %c0_18, %c0_19] : memref<3x8x32xf32, #tpu.memory_space<vmem>>, vector<1x8x32xf32>
    %37 = vector.shape_cast %36 : vector<1x8x32xf32> to vector<8x32xf32>
    %38 = vector.shape_cast %30 : vector<8x32xf32> to vector<1x8x32xf32>
    tpu.vector_store %arg13[%c0_17, %c0_18, %c0_19], %38 {strides = array<i32>} : memref<3x8x32xf32, #tpu.memory_space<vmem>>, vector<1x8x32xf32>,
    %c1 = arith.constant 1 : index
    %c0_20 = arith.constant 0 : index
    %c0_21 = arith.constant 0 : index
    %39 = vector.load %arg1[%c1, %c0_20, %c0_21] : memref<3x8x32xf32, #tpu.memory_space<vmem>>, vector<1x8x32xf32>
    %40 = vector.shape_cast %39 : vector<1x8x32xf32> to vector<8x32xf32>
    %c1_22 = arith.constant 1 : index
    %c0_23 = arith.constant 0 : index
    %c0_24 = arith.constant 0 : index
    %41 = vector.load %arg2[%c1_22, %c0_23, %c0_24] : memref<3x8x32xf32, #tpu.memory_space<vmem>>, vector<1x8x32xf32>
    %42 = vector.shape_cast %41 : vector<1x8x32xf32> to vector<8x32xf32>
    %c0_25 = arith.constant 0 : index
    %c0_26 = arith.constant 0 : index
    %43 = vector.load %arg5[%c0_25, %c0_26] : memref<64x128xf32, #tpu.memory_space<vmem>>, vector<32x128xf32>
    %cst_27 = arith.constant dense<0.000000e+00> : vector<8x128xf32>
    %44 = tpu.matmul %32, %43, %cst_27 {dimension_numbers = #tpu.dot_dimension_numbers<[1], [0], [0], [1], [0, 0, 1, 1], [], []>, precision = #tpu.contract_precision<fp32>} : vector<8x32xf32>, vector<32x128xf32>, vector<8x128xf32> -> vector<8x128xf32>
    %c32_28 = arith.constant 32 : index
    %c0_29 = arith.constant 0 : index
    %45 = vector.load %arg5[%c32_28, %c0_29] : memref<64x128xf32, #tpu.memory_space<vmem>>, vector<32x128xf32>
    %cst_30 = arith.constant dense<0.000000e+00> : vector<8x128xf32>
    %46 = tpu.matmul %40, %45, %cst_30 {dimension_numbers = #tpu.dot_dimension_numbers<[1], [0], [0], [1], [0, 0, 1, 1], [], []>, precision = #tpu.contract_precision<fp32>} : vector<8x32xf32>, vector<32x128xf32>, vector<8x128xf32> -> vector<8x128xf32>
    %47 = arith.addf %44, %46 : vector<8x128xf32>
    %c0_31 = arith.constant 0 : index
    %c0_32 = arith.constant 0 : index
    %48 = vector.load %arg6[%c0_31, %c0_32] : memref<1x128xf32, #tpu.memory_space<vmem>>, vector<1x128xf32>
    %49 = vector.broadcast %48 : vector<1x128xf32> to vector<8x128xf32>
    %50 = arith.addf %47, %49 : vector<8x128xf32>
    %51 = arith.negf %50 : vector<8x128xf32>
    %52 = math.exp %51 : vector<8x128xf32>
    %cst_33 = arith.constant 1.000000e+00 : f32
    %53 = vector.broadcast %cst_33 : f32 to vector<8x128xf32>
    %54 = arith.addf %53, %52 : vector<8x128xf32>
    %55 = arith.divf %53, %54 : vector<8x128xf32>
    %56 = math.tanh %50 : vector<8x128xf32>
    %57 = vector.extract_strided_slice %55 {offsets = [0, 0], sizes = [8, 32], strides = [1, 1]} : vector<8x128xf32> to vector<8x32xf32>
    %58 = vector.extract_strided_slice %55 {offsets = [0, 32], sizes = [8, 32], strides = [1, 1]} : vector<8x128xf32> to vector<8x32xf32>
    %59 = vector.extract_strided_slice %56 {offsets = [0, 64], sizes = [8, 32], strides = [1, 1]} : vector<8x128xf32> to vector<8x32xf32>
    %60 = vector.extract_strided_slice %55 {offsets = [0, 96], sizes = [8, 32], strides = [1, 1]} : vector<8x128xf32> to vector<8x32xf32>
    %61 = arith.mulf %58, %42 : vector<8x32xf32>
    %62 = arith.mulf %57, %59 : vector<8x32xf32>
    %63 = arith.addf %61, %62 : vector<8x32xf32>
    %64 = math.tanh %63 : vector<8x32xf32>
    %65 = arith.mulf %60, %64 : vector<8x32xf32>
    %c1_34 = arith.constant 1 : index
    %c0_35 = arith.constant 0 : index
    %c0_36 = arith.constant 0 : index
    %66 = vector.load %arg12[%c1_34, %c0_35, %c0_36] : memref<3x8x32xf32, #tpu.memory_space<vmem>>, vector<1x8x32xf32>
    %67 = vector.shape_cast %66 : vector<1x8x32xf32> to vector<8x32xf32>
    %68 = vector.shape_cast %65 : vector<8x32xf32> to vector<1x8x32xf32>
    tpu.vector_store %arg12[%c1_34, %c0_35, %c0_36], %68 {strides = array<i32>} : memref<3x8x32xf32, #tpu.memory_space<vmem>>, vector<1x8x32xf32>,
    %c1_37 = arith.constant 1 : index
    %c0_38 = arith.constant 0 : index
    %c0_39 = arith.constant 0 : index
    %69 = vector.load %arg13[%c1_37, %c0_38, %c0_39] : memref<3x8x32xf32, #tpu.memory_space<vmem>>, vector<1x8x32xf32>
    %70 = vector.shape_cast %69 : vector<1x8x32xf32> to vector<8x32xf32>
    %71 = vector.shape_cast %63 : vector<8x32xf32> to vector<1x8x32xf32>
    tpu.vector_store %arg13[%c1_37, %c0_38, %c0_39], %71 {strides = array<i32>} : memref<3x8x32xf32, #tpu.memory_space<vmem>>, vector<1x8x32xf32>,
    %c2 = arith.constant 2 : index
    %c0_40 = arith.constant 0 : index
    %c0_41 = arith.constant 0 : index
    %72 = vector.load %arg1[%c2, %c0_40, %c0_41] : memref<3x8x32xf32, #tpu.memory_space<vmem>>, vector<1x8x32xf32>
    %73 = vector.shape_cast %72 : vector<1x8x32xf32> to vector<8x32xf32>
    %c2_42 = arith.constant 2 : index
    %c0_43 = arith.constant 0 : index
    %c0_44 = arith.constant 0 : index
    %74 = vector.load %arg2[%c2_42, %c0_43, %c0_44] : memref<3x8x32xf32, #tpu.memory_space<vmem>>, vector<1x8x32xf32>
    %75 = vector.shape_cast %74 : vector<1x8x32xf32> to vector<8x32xf32>
    %c0_45 = arith.constant 0 : index
    %c0_46 = arith.constant 0 : index
    %76 = vector.load %arg7[%c0_45, %c0_46] : memref<64x128xf32, #tpu.memory_space<vmem>>, vector<32x128xf32>
    %cst_47 = arith.constant dense<0.000000e+00> : vector<8x128xf32>
    %77 = tpu.matmul %65, %76, %cst_47 {dimension_numbers = #tpu.dot_dimension_numbers<[1], [0], [0], [1], [0, 0, 1, 1], [], []>, precision = #tpu.contract_precision<fp32>} : vector<8x32xf32>, vector<32x128xf32>, vector<8x128xf32> -> vector<8x128xf32>
    %c32_48 = arith.constant 32 : index
    %c0_49 = arith.constant 0 : index
    %78 = vector.load %arg7[%c32_48, %c0_49] : memref<64x128xf32, #tpu.memory_space<vmem>>, vector<32x128xf32>
    %cst_50 = arith.constant dense<0.000000e+00> : vector<8x128xf32>
    %79 = tpu.matmul %73, %78, %cst_50 {dimension_numbers = #tpu.dot_dimension_numbers<[1], [0], [0], [1], [0, 0, 1, 1], [], []>, precision = #tpu.contract_precision<fp32>} : vector<8x32xf32>, vector<32x128xf32>, vector<8x128xf32> -> vector<8x128xf32>
    %80 = arith.addf %77, %79 : vector<8x128xf32>
    %c0_51 = arith.constant 0 : index
    %c0_52 = arith.constant 0 : index
    %81 = vector.load %arg8[%c0_51, %c0_52] : memref<1x128xf32, #tpu.memory_space<vmem>>, vector<1x128xf32>
    %82 = vector.broadcast %81 : vector<1x128xf32> to vector<8x128xf32>
    %83 = arith.addf %80, %82 : vector<8x128xf32>
    %84 = arith.negf %83 : vector<8x128xf32>
    %85 = math.exp %84 : vector<8x128xf32>
    %cst_53 = arith.constant 1.000000e+00 : f32
    %86 = vector.broadcast %cst_53 : f32 to vector<8x128xf32>
    %87 = arith.addf %86, %85 : vector<8x128xf32>
    %88 = arith.divf %86, %87 : vector<8x128xf32>
    %89 = math.tanh %83 : vector<8x128xf32>
    %90 = vector.extract_strided_slice %88 {offsets = [0, 0], sizes = [8, 32], strides = [1, 1]} : vector<8x128xf32> to vector<8x32xf32>
    %91 = vector.extract_strided_slice %88 {offsets = [0, 32], sizes = [8, 32], strides = [1, 1]} : vector<8x128xf32> to vector<8x32xf32>
    %92 = vector.extract_strided_slice %89 {offsets = [0, 64], sizes = [8, 32], strides = [1, 1]} : vector<8x128xf32> to vector<8x32xf32>
    %93 = vector.extract_strided_slice %88 {offsets = [0, 96], sizes = [8, 32], strides = [1, 1]} : vector<8x128xf32> to vector<8x32xf32>
    %94 = arith.mulf %91, %75 : vector<8x32xf32>
    %95 = arith.mulf %90, %92 : vector<8x32xf32>
    %96 = arith.addf %94, %95 : vector<8x32xf32>
    %97 = math.tanh %96 : vector<8x32xf32>
    %98 = arith.mulf %93, %97 : vector<8x32xf32>
    %c2_54 = arith.constant 2 : index
    %c0_55 = arith.constant 0 : index
    %c0_56 = arith.constant 0 : index
    %99 = vector.load %arg12[%c2_54, %c0_55, %c0_56] : memref<3x8x32xf32, #tpu.memory_space<vmem>>, vector<1x8x32xf32>
    %100 = vector.shape_cast %99 : vector<1x8x32xf32> to vector<8x32xf32>
    %101 = vector.shape_cast %98 : vector<8x32xf32> to vector<1x8x32xf32>
    tpu.vector_store %arg12[%c2_54, %c0_55, %c0_56], %101 {strides = array<i32>} : memref<3x8x32xf32, #tpu.memory_space<vmem>>, vector<1x8x32xf32>,
    %c2_57 = arith.constant 2 : index
    %c0_58 = arith.constant 0 : index
    %c0_59 = arith.constant 0 : index
    %102 = vector.load %arg13[%c2_57, %c0_58, %c0_59] : memref<3x8x32xf32, #tpu.memory_space<vmem>>, vector<1x8x32xf32>
    %103 = vector.shape_cast %102 : vector<1x8x32xf32> to vector<8x32xf32>
    %104 = vector.shape_cast %96 : vector<8x32xf32> to vector<1x8x32xf32>
    tpu.vector_store %arg13[%c2_57, %c0_58, %c0_59], %104 {strides = array<i32>} : memref<3x8x32xf32, #tpu.memory_space<vmem>>, vector<1x8x32xf32>,
    %c0_60 = arith.constant 0 : index
    %c0_61 = arith.constant 0 : index
    %105 = vector.load %arg9[%c0_60, %c0_61] : memref<32x32xf32, #tpu.memory_space<vmem>>, vector<32x32xf32>
    %cst_62 = arith.constant dense<0.000000e+00> : vector<8x32xf32>
    %106 = tpu.matmul %98, %105, %cst_62 {dimension_numbers = #tpu.dot_dimension_numbers<[1], [0], [0], [1], [0, 0, 1, 1], [], []>, precision = #tpu.contract_precision<fp32>} : vector<8x32xf32>, vector<32x32xf32>, vector<8x32xf32> -> vector<8x32xf32>
    %c0_63 = arith.constant 0 : index
    %c0_64 = arith.constant 0 : index
    %107 = vector.load %arg10[%c0_63, %c0_64] : memref<1x32xf32, #tpu.memory_space<vmem>>, vector<1x32xf32>
    %108 = vector.broadcast %107 : vector<1x32xf32> to vector<8x32xf32>
    %109 = arith.addf %106, %108 : vector<8x32xf32>
    %c0_65 = arith.constant 0 : index
    %c0_66 = arith.constant 0 : index
    %110 = vector.load %arg11[%c0_65, %c0_66] : memref<8x32xf32, #tpu.memory_space<vmem>>, vector<8x32xf32>
    tpu.vector_store %arg11[%c0_65, %c0_66], %109 {strides = array<i32>} : memref<8x32xf32, #tpu.memory_space<vmem>>, vector<8x32xf32>,
    return
  }
}

</mosaic_0001>

<bundles_post_ra>
// kernel: generative_model_forward.1
= control target key start
LH: loop header
LB: loop body
LE: loop exit
PB: predicated region body
PF: predicated region fallthrough
CT: control target
= control target key end

     0   :  { %19 = vsyncpa [#allocation3], 0  ;;  %s5578_s0 = inlined_call_operand.vmem [shape: s32[8,1], index: 0, kind: input, shape index: {}]   ;;  %s5579_s1 = inlined_call_operand.hbm [shape: f32[3,8,32], index: 1, kind: input, shape index: {}, may-alias: {1,12}]   ;;  %s5580_s2 = inlined_call_operand.hbm [shape: f32[3,8,32], index: 2, kind: input, shape index: {}, may-alias: {2,13}]   ;;  %s5581_s3 = inlined_call_operand.hbm [shape: f32[64,128], index: 3, kind: input, shape index: {}]   ;;  %s5582_s4 = inlined_call_operand.vmem [shape: f32[1,128], index: 4, kind: input, shape index: {}]   ;;  %s5583_s5 = inlined_call_operand.hbm [shape: f32[64,128], index: 5, kind: input, shape index: {}]   ;;  %s5584_s6 = inlined_call_operand.vmem [shape: f32[1,128], index: 6, kind: input, shape index: {}]   ;;  %s5585_s7 = inlined_call_operand.hbm [shape: f32[64,128], index: 7, kind: input, shape index: {}]   ;;  %s5586_s8 = inlined_call_operand.vmem [shape: f32[1,128], index: 8, kind: input, shape index: {}]   ;;  %s5587_s9 = inlined_call_operand.hbm [shape: f32[32,32], index: 9, kind: input, shape index: {}]   ;;  %s5588_s10 = inlined_call_operand.vmem [shape: f32[1,32], index: 10, kind: input, shape index: {}]   ;;  %s5589_s11 = inlined_call_operand.hbm [shape: f32[8,32], index: 11, kind: output, shape index: {0}]   ;;  %s5590_s12 = inlined_call_operand.hbm [shape: f32[3,8,32], index: 12, kind: output, shape index: {1}, may-alias: {1,12}]   ;;  %s5591_s13 = inlined_call_operand.hbm [shape: f32[3,8,32], index: 13, kind: output, shape index: {2}, may-alias: {2,13}]  }
   0x1   :  { %20 = vsyncpa [#allocation6], 0 }
   0x2   :  { %21 = vsyncpa [#allocation9], 0 }
   0x3   :  { %22 = vsyncpa [#allocation12], 0 }
   0x4   :  { %23 = vsyncpa [#allocation4], 0 }
   0x5   :  { %24 = vsyncpa [#allocation15], 0  ;;  %s4702_s25 = smov [#allocation5]   ;;  %s4703_s27 = smov [#allocation8]  }
   0x6   :  { %s44_s26 = sshll.u32 %s4702_s25, 4  ;;  %s70_s28 = sshll.u32 %s4703_s27, 4  ;;  %s45_s26 = int_to_ptr.vmem [resolvable:$true] %s44_s26  ;;  %s71_s28 = int_to_ptr.vmem [resolvable:$true] %s70_s28 }
   0x7   :  { %s4518_s29 = scalar_lea.vmem %s45_s26, 384  ;;  %p4523_p1 = scmp.lt.s32.totalorder %s45_s26, %s45_s26 }
   0x8   :  { %p4519_p0 = scmp.ne.s32.totalorder %s45_s26, %s4518_s29  ;;  %p4524_p2 = scmp.lt.s32.totalorder %s4518_s29, %s4518_s29 }
   0xa   :  { %p4525_p3 = por %p4524_p2, %p4523_p1 }
   0xc   :  { %p4526_p4 = pnand %p4525_p3, %p4519_p0 }
   0xe   :  { %4529 = shalt.err (!%p4526_p4)
}
   0xf   :  { %s4704_s30 = smov 128   ;;  %s4705_s14 = smov 8  }
  0x10   :  { %50 = dma.hbm_to_vmem [thread:$0]  %s5580_s2, 384, %s45_s26, [#allocation6], %s4704_s30, %s4704_s30, %s4705_s14  }
  0x11   :  { %s4538_s17 = scalar_lea.vmem %s71_s28, 1024  ;;  %p4543_p6 = scmp.lt.s32.totalorder %s71_s28, %s71_s28 }
  0x12   :  { %p4539_p5 = scmp.ne.s32.totalorder %s71_s28, %s4538_s17  ;;  %p4544_p7 = scmp.lt.s32.totalorder %s4538_s17, %s4538_s17 }
  0x14   :  { %p4545_p8 = por %p4544_p7, %p4543_p6 }
  0x16   :  { %p4546_p9 = pnand %p4545_p8, %p4539_p5 }
  0x18   :  { %4549 = shalt.err (!%p4546_p9)
}
  0x19   :  { %76 = dma.hbm_to_vmem [thread:$0]  %s5583_s5, 1024, %s71_s28, [#allocation9], %s4704_s30, %s4704_s30, %s4705_s14  }
  0x1a   :  { %s4706_s20 = smov [#allocation2]   ;;  %s4707_s22 = smov [#allocation7]  }
  0x1b   :  { %s32_s21 = sshll.u32 %s4706_s20, 4  ;;  %s56_s23 = sshll.u32 %s4707_s22, 4  ;;  %s33_s21 = int_to_ptr.vmem [resolvable:$true] %s32_s21  ;;  %s57_s23 = int_to_ptr.vmem [resolvable:$true] %s56_s23 }
  0x1c   :  { %s4558_s2 = scalar_lea.vmem %s33_s21, 384  ;;  %p4563_p11 = scmp.lt.s32.totalorder %s33_s21, %s33_s21 }
  0x1d   :  { %p4559_p10 = scmp.ne.s32.totalorder %s33_s21, %s4558_s2  ;;  %p4564_p12 = scmp.lt.s32.totalorder %s4558_s2, %s4558_s2 }
  0x1f   :  { %p4565_p13 = por %p4564_p12, %p4563_p11 }
  0x21   :  { %p4566_p0 = pnand %p4565_p13, %p4559_p10 }
  0x23   :  { %4569 = shalt.err (!%p4566_p0)
}
  0x24   :  { %38 = dma.hbm_to_vmem [thread:$0]  %s5579_s1, 384, %s33_s21, [#allocation3], %s4704_s30, %s4704_s30, %s4705_s14  }
  0x25   :  { %s4578_s5 = scalar_lea.vmem %s57_s23, 1024  ;;  %p4583_p2 = scmp.lt.s32.totalorder %s57_s23, %s57_s23 }
  0x26   :  { %p4579_p1 = scmp.ne.s32.totalorder %s57_s23, %s4578_s5  ;;  %p4584_p3 = scmp.lt.s32.totalorder %s4578_s5, %s4578_s5 }
  0x28   :  { %p4585_p4 = por %p4584_p3, %p4583_p2 }
  0x2a   :  { %p4586_p5 = pnand %p4585_p4, %p4579_p1 }
  0x2c   :  { %4589 = shalt.err (!%p4586_p5)
}
  0x2d   :  { %62 = dma.hbm_to_vmem [thread:$0]  %s5581_s3, 1024, %s57_s23, [#allocation6], %s4704_s30, %s4704_s30, %s4705_s14  }
  0x2e   :  { %s4708_s28 = smov [#allocation10]   ;;  %s4709_s15 = smov [#allocation11]  }
  0x2f   :  { %s84_s29 = sshll.u32 %s4708_s28, 4  ;;  %s98_s16 = sshll.u32 %s4709_s15, 4  ;;  %s85_s29 = int_to_ptr.vmem [resolvable:$true] %s84_s29  ;;  %s99_s16 = int_to_ptr.vmem [resolvable:$true] %s98_s16 }
  0x30   :  { %s4598_s1 = scalar_lea.vmem %s85_s29, 1024  ;;  %p4603_p7 = scmp.lt.s32.totalorder %s85_s29, %s85_s29 }
  0x31   :  { %p4599_p6 = scmp.ne.s32.totalorder %s85_s29, %s4598_s1  ;;  %p4604_p8 = scmp.lt.s32.totalorder %s4598_s1, %s4598_s1 }
  0x33   :  { %p4605_p9 = por %p4604_p8, %p4603_p7 }
  0x35   :  { %p4606_p10 = pnand %p4605_p9, %p4599_p6 }
  0x37   :  { %4609 = shalt.err (!%p4606_p10)
}
  0x38   :  { %90 = dma.hbm_to_vmem [thread:$0]  %s5585_s7, 1024, %s85_s29, [#allocation9], %s4704_s30, %s4704_s30, %s4705_s14  }
  0x39   :  { %s4618_s3 = scalar_lea.vmem %s99_s16, 512  ;;  %p4623_p12 = scmp.lt.s32.totalorder %s99_s16, %s99_s16 }
  0x3a   :  { %p4619_p11 = scmp.ne.s32.totalorder %s99_s16, %s4618_s3  ;;  %p4624_p13 = scmp.lt.s32.totalorder %s4618_s3, %s4618_s3 }
  0x3c   :  { %p4625_p0 = por %p4624_p13, %p4623_p12 }
  0x3e   :  { %p4626_p1 = pnand %p4625_p0, %p4619_p11 }
  0x40   :  { %4629 = shalt.err (!%p4626_p1)
}
  0x41   :  { %104 = dma.hbm_to_vmem [thread:$0]  %s5587_s9, 512, %s99_s16, [#allocation12], %s4704_s30, %s4704_s30, %s4705_s14  }
  0x42   :  { %4690 = dma.done.wait [#allocation3], 384  }
  0x43   :  { %4691 = vsyncadd [#allocation3], 4294966912 }
  0x44   :  { %4692 = dma.done.wait [#allocation6], 1408  }
  0x45   :  { %4693 = vsyncadd [#allocation6], 4294965888 }
  0x46   :  { %4694 = dma.done.wait [#allocation9], 2048  }
  0x47   :  { %4695 = vsyncadd [#allocation9], 4294965248 }
  0x48   :  { %4696 = dma.done.wait [#allocation12], 512  }
  0x49   :  { %4697 = vsyncadd [#allocation12], 4294966784  ;;  %v4710_v0 = vmov 0   ;;  %v4711_v1 = vmov 0.0   ;;  %vm4712_vm0 = vmmov 0   ;;  %vm144_vm1 = vcmask 261120  }
  0x4a   :  { %4485 = vset.pattern.permute.xlu0 %v4710_v0  ;;  %4006 = vmatprep.subr.mxu0 %v4711_v1  ;;  %v125_v2 = vld [vmem:[%s5578_s0] sm:$0xff]  ;;  %v143_v3 = vld [vmem:[#allocation7 + $0x38] sm:$0xff]  ;;  %v141_v7 = vld [vmem:[#allocation7 + $0x28] sm:$0xff]  ;;  %s4713_s0 = smov 32   ;;  %v126_v59 = vlaneseq  ;;  %s4714_s23 = smov 64  }
  0x4b   :  { %4017 = vmatprep.subr.mxu1 %v4711_v1  ;;  %4014 = vmatprep.mubr.msk.f32.mxu0 %vm4712_vm0, %v4711_v1  ;;  %v142_v4 = vld [vmem:[#allocation7 + $0x30] sm:$0xff]  ;;  %v4834_v5 = vand.u32 4294901760, %v143_v3  ;;  %v140_v8 = vld [vmem:[#allocation7 + $0x20] sm:$0xff]  ;;  %v4838_v10 = vand.u32 4294901760, %v141_v7  ;;  %v139_v34 = vld [vmem:[#allocation7 + $0x18] sm:$0xff]  ;;  %s4716_s25 = smov [#allocation14]  }
  0x4c   :  { %4025 = vmatprep.mubr.msk.f32.mxu1 %vm4712_vm0, %v4711_v1  ;;  %129 = vperm.xlu0 %4485, %v125_v2   ;;  %v4836_v6 = vand.u32 4294901760, %v142_v4  ;;  %v134_v9 = vld [vmem:[#allocation2] sm:$0xff]  ;;  %v4840_v11 = vand.u32 4294901760, %v140_v8  ;;  %v4889_v36 = vand.u32 4294901760, %v139_v34  ;;  %v137_v37 = vld [vmem:[#allocation7 + $0x8] sm:$0xff]  ;;  %v136_v39 = vld [vmem:[#allocation7] sm:$0xff] }
  0x4d   :  { %v146_v12 = vsel %vm144_vm1, %v134_v9, 0  ;;  %4007 = vmatpush3.msra.mxu0 %v4834_v5  ;;  %v4845_v13 = vsub.f32 %v143_v3, %v4834_v5  ;;  %v4854_v16 = vsub.f32 %v141_v7, %v4838_v10  ;;  %v138_v35 = vld [vmem:[#allocation7 + $0x10] sm:$0xff]  ;;  %v4904_v41 = vand.u32 4294901760, %v137_v37  ;;  %v135_v58 = vld [vmem:[#allocation5] sm:$0xff]  ;;  %s3751_s5 = sshll.u32 %s4716_s25, 4  ;;  %s3752_s5 = int_to_ptr.vmem [resolvable:$true] %s3751_s5 }
  0x4e   :  { %v4848_v14 = vsub.f32 %v142_v4, %v4836_v6  ;;  %v4850_v15 = vand.u32 4294901760, %v146_v12  ;;  %4008 = vmatprep.subr.mxu0 %v4711_v1  ;;  %v4857_v17 = vsub.f32 %v140_v8, %v4840_v11  ;;  %v4895_v38 = vand.u32 4294901760, %v138_v35  ;;  %1137 = vrot.lane.b32.xlu1 %v135_v58, %s4713_s0  ;;  %s4630_s26 = scalar_lea.vmem %s3752_s5, 384  ;;  %p4635_p3 = scmp.lt.s32.totalorder %s3752_s5, %s3752_s5 }
  0x4f   :  { %v254_v18 = vand.u32 4294901760, %v4845_v13  ;;  %4009 = vmatpush3.msra.mxu0 %v4836_v6  ;;  %v268_v21 = vand.u32 4294901760, %v4854_v16  ;;  %v4902_v40 = vsub.f32 %v139_v34, %v4889_v36  ;;  %v4915_v43 = vand.u32 4294901760, %v136_v39  ;;  %p4631_p2 = scmp.ne.s32.totalorder %s3752_s5, %s4630_s26  ;;  %p4636_p4 = scmp.lt.s32.totalorder %s4630_s26, %s4630_s26 }
  0x50   :  { %v261_v19 = vand.u32 4294901760, %v4848_v14  ;;  %v218_v20 = vsub.f32 %v146_v12, %v4850_v15  ;;  %4010 = vmatprep.subr.mxu0 %v4711_v1  ;;  %v275_v22 = vand.u32 4294901760, %v4857_v17  ;;  %v4913_v42 = vsub.f32 %v138_v35, %v4895_v38 }
  0x51   :  { %v255_v23 = vsub.f32 %v4845_v13, %v254_v18  ;;  %4011 = vmatpush3.msra.mxu0 %v4838_v10  ;;  %v269_v26 = vsub.f32 %v4854_v16, %v268_v21  ;;  %v742_v44 = vand.u32 4294901760, %v4902_v40  ;;  %v4922_v45 = vsub.f32 %v137_v37, %v4904_v41  ;;  %p4637_p5 = por %p4636_p4, %p4635_p3 }
  0x52   :  { %v262_v24 = vsub.f32 %v4848_v14, %v261_v19  ;;  %v219_v25 = vand.u32 4294901760, %v218_v20  ;;  %4012 = vmatprep.subr.mxu0 %v4711_v1  ;;  %v276_v29 = vsub.f32 %v4857_v17, %v275_v22  ;;  %v749_v46 = vand.u32 4294901760, %v4913_v42 }
  0x53   :  { %v256_v27 = vand.u32 4294901760, %v255_v23  ;;  %4013 = vmatpush3.msra.mxu0 %v4840_v11  ;;  %v270_v31 = vand.u32 4294901760, %v269_v26  ;;  %v4930_v47 = vsub.f32 %v136_v39, %v4915_v43  ;;  %v743_v48 = vsub.f32 %v4902_v40, %v742_v44  ;;  %p4638_p6 = pnand %p4637_p5, %p4631_p2 }
  0x54   :  { %v263_v28 = vand.u32 4294901760, %v262_v24  ;;  %v220_v30 = vsub.f32 %v218_v20, %v219_v25  ;;  %4028 = vmatprep.subr.mxu0 %v4711_v1  ;;  %v277_v33 = vand.u32 4294901760, %v276_v29  ;;  %v756_v49 = vand.u32 4294901760, %v4922_v45 }
  0x55   :  { %4018 = vmatpush3.msra.mxu1 %v256_v27  ;;  %v750_v50 = vsub.f32 %v4913_v42, %v749_v46  ;;  %v763_v51 = vand.u32 4294901760, %v4930_v47  ;;  %v744_v52 = vand.u32 4294901760, %v743_v48  ;;  %v127_v60 = vand.u32 127, %v126_v59  ;;  %v1175_v59 = vld [vmem:[#allocation8 + $0x20] sm:$0xff] }
  0x56   :  { %v221_v32 = vand.u32 4294901760, %v220_v30  ;;  %4019 = vmatprep.subr.mxu1 %v4711_v1  ;;  %v757_v53 = vsub.f32 %v4922_v45, %v756_v49 }
  0x57   :  { %4020 = vmatpush3.msra.mxu1 %v263_v28  ;;  %v751_v54 = vand.u32 4294901760, %v750_v50  ;;  %v764_v55 = vsub.f32 %v4930_v47, %v763_v51 }
  0x58   :  { %4015 = vmatmul.mubr.f32.vlgmr.msra.gmra.mxu0 %v221_v32  ;;  %4021 = vmatprep.subr.mxu1 %v4711_v1  ;;  %v758_v56 = vand.u32 4294901760, %v757_v53  ;;  %v1178_v53 = vld [vmem:[#allocation8 + $0x38] sm:$0xff] }
  0x59   :  { %4029 = vmatpush3.msra.mxu0 %v4845_v13  ;;  %4022 = vmatpush3.msra.mxu1 %v270_v31  ;;  %v765_v57 = vand.u32 4294901760, %v764_v55  ;;  %v1176_v55 = vld [vmem:[#allocation8 + $0x28] sm:$0xff] }
  0x5a   :  { %4030 = vmatprep.subr.mxu0 %v4711_v1  ;;  %4023 = vmatprep.subr.mxu1 %v4711_v1  ;;  %v5055_v58 = vand.u32 4294901760, %v1176_v55 }
  0x5b   :  { %4031 = vmatpush3.msra.mxu0 %v4848_v14  ;;  %4024 = vmatpush3.msra.mxu1 %v277_v33 }
  0x5c   :  { %4032 = vmatprep.subr.mxu0 %v4711_v1  ;;  %4039 = vmatprep.subr.mxu1 %v4711_v1 }
  0x5d   :  { %4026 = vmatmul.mubr.f32.vlgmr.msra.gmra.mxu1 %v4850_v15  ;;  %4033 = vmatpush3.msra.mxu0 %v4854_v16 }
  0x5e   :  { %4040 = vmatpush3.msra.mxu1 %v4834_v5  ;;  %4034 = vmatprep.subr.mxu0 %v4711_v1 }
  0x5f   :  { %4041 = vmatprep.subr.mxu1 %v4711_v1  ;;  %4035 = vmatpush3.msra.mxu0 %v4857_v17 }
  0x60   :  { %4042 = vmatpush3.msra.mxu1 %v4836_v6  ;;  %4036 = vmatprep.mubr.msk.f32.mxu0 %vm4712_vm0, %v4711_v1 }
  0x61   :  { %4043 = vmatprep.subr.mxu1 %v4711_v1  ;;  %4047 = vmatprep.mubr.msk.f32.mxu1 %vm4712_vm0, %v4711_v1 }
  0x62   :  { %4044 = vmatpush3.msra.mxu1 %v4838_v10  ;;  %4050 = vmatprep.subr.mxu0 %v4711_v1 }
  0x63   :  { %4045 = vmatprep.subr.mxu1 %v4711_v1  ;;  %4037 = vmatmul.mubr.f32.vlgmr.msra.gmra.mxu0 %v218_v20 }
  0x64   :  { %4046 = vmatpush3.msra.mxu1 %v4840_v11  ;;  %4051 = vmatpush3.msra.mxu0 %v254_v18 }
  0x65   :  { %4061 = vmatprep.subr.mxu1 %v4711_v1  ;;  %4048 = vmatmul.mubr.f32.vlgmr.msra.gmra.mxu1 %v219_v25 }
  0x66   :  { %4062 = vmatpush3.msra.mxu1 %v4834_v5  ;;  %4052 = vmatprep.subr.mxu0 %v4711_v1 }
  0x67   :  { %4063 = vmatprep.subr.mxu1 %v4711_v1  ;;  %4053 = vmatpush3.msra.mxu0 %v261_v19 }
  0x68   :  { %4064 = vmatpush3.msra.mxu1 %v4836_v6  ;;  %4054 = vmatprep.subr.mxu0 %v4711_v1 }
  0x69   :  { %4065 = vmatprep.subr.mxu1 %v4711_v1  ;;  %4055 = vmatpush3.msra.mxu0 %v268_v21 }
  0x6a   :  { %4066 = vmatpush3.msra.mxu1 %v4838_v10  ;;  %4056 = vmatprep.subr.mxu0 %v4711_v1 }
  0x6b   :  { %4067 = vmatprep.subr.mxu1 %v4711_v1  ;;  %4057 = vmatpush3.msra.mxu0 %v275_v22 }
  0x6c   :  { %4058 = vmatprep.mubr.msk.f32.mxu0 %vm4712_vm0, %v4711_v1  ;;  %4068 = vmatpush3.msra.mxu1 %v4840_v11 }
  0x6d   :  { %4059 = vmatmul.mubr.f32.vlgmr.msra.gmra.mxu0 %v4850_v15  ;;  %4069 = vmatprep.mubr.msk.f32.mxu1 %vm4712_vm0, %v4711_v1 }
  0x6e   :  { %4083 = vmatprep.subr.mxu1 %v4711_v1  ;;  %4070 = vmatmul.mubr.f32.vlgmr.msra.gmra.mxu1 %v4850_v15 }
  0x6f   :  { %4072 = vmatprep.subr.mxu0 %v4711_v1  ;;  %4084 = vmatpush3.msra.mxu1 %v744_v52 }
  0x70   :  { %4091 = vmatprep.mubr.msk.f32.mxu1 %vm4712_vm0, %v4711_v1  ;;  %4085 = vmatprep.subr.mxu1 %v4711_v1 }
  0x71   :  { %4073 = vmatpush3.msra.mxu0 %v4889_v36  ;;  %4086 = vmatpush3.msra.mxu1 %v751_v54  ;;  %v1177_v54 = vld [vmem:[#allocation8 + $0x30] sm:$0xff] }
  0x72   :  { %4074 = vmatprep.subr.mxu0 %v4711_v1  ;;  %4087 = vmatprep.subr.mxu1 %v4711_v1 }
  0x73   :  { %4075 = vmatpush3.msra.mxu0 %v4895_v38  ;;  %4088 = vmatpush3.msra.mxu1 %v758_v56  ;;  %v5051_v56 = vand.u32 4294901760, %v1178_v53 }
  0x74   :  { %4076 = vmatprep.subr.mxu0 %v4711_v1  ;;  %4089 = vmatprep.subr.mxu1 %v4711_v1 }
  0x75   :  { %4077 = vmatpush3.msra.mxu0 %v4904_v41  ;;  %4090 = vmatpush3.msra.mxu1 %v765_v57  ;;  %v5053_v57 = vand.u32 4294901760, %v1177_v54 }
  0x76   :  { %4078 = vmatprep.subr.mxu0 %v4711_v1  ;;  %4105 = vmatprep.subr.mxu1 %v4711_v1 }
  0x77   :  { %4079 = vmatpush3.msra.mxu0 %v4915_v43  ;;  %4080 = vmatprep.mubr.msk.f32.mxu0 %vm4712_vm0, %v4711_v1 }
  0x78   :  { %4094 = vmatprep.subr.mxu0 %v4711_v1 }
  0xc7   :  { %v130_v61 = vpop.permute.xlu0 %129 }
  0xc8   :  { %vm131_vm2 = vcmp.eq.s32.totalorder %v127_v60, %v130_v61  ;;  %v1168_v60 = vld [vmem:[#allocation2 + $0x8] sm:$0xff]  ;;  %v5057_v61 = vand.u32 4294901760, %v1175_v59 }
  0xc9   :  { %v3785_v62 = vsel %vm131_vm2, 1.0, %v4711_v1 }
  0xca   :  { %v634_v63 = vsel %vm144_vm1, %v3785_v62, 0  ;;  %4092 = vmatmul.mubr.msk.f32.vlgmr.msra.gmra.mxu1 %vm144_vm1, %v3785_v62 }
  0xcb   :  { %v706_v0 = vsub.f32 %v634_v63, %v634_v63  ;;  %4106 = vmatpush3.msra.mxu1 %v4889_v36  ;;  %4113 = vmatprep.mubr.msk.f32.mxu1 %vm4712_vm0, %v4711_v1  ;;  %v5062_v63 = vsub.f32 %v1178_v53, %v5051_v56 }
  0xcc   :  { %4107 = vmatprep.subr.mxu1 %v4711_v1 }
  0xcd   :  { %4108 = vmatpush3.msra.mxu1 %v4895_v38  ;;  %v707_v2 = vand.u32 4294901760, %v706_v0 }
  0xce   :  { %4109 = vmatprep.subr.mxu1 %v4711_v1 }
  0xcf   :  { %4110 = vmatpush3.msra.mxu1 %v4904_v41  ;;  %v708_v3 = vsub.f32 %v706_v0, %v707_v2 }
  0xd0   :  { %4111 = vmatprep.subr.mxu1 %v4711_v1 }
  0xd1   :  { %4112 = vmatpush3.msra.mxu1 %v4915_v43  ;;  %v709_v4 = vand.u32 4294901760, %v708_v3 }
  0xd2   :  { %4114 = vmatmul.mubr.f32.vlgmr.msra.gmra.mxu1 %v707_v2  ;;  %4127 = vmatprep.subr.mxu1 %v4711_v1  ;;  %v5068_v2 = vsub.f32 %v1176_v55, %v5055_v58 }
  0xd3   :  { %4128 = vmatpush3.msra.mxu1 %v4889_v36  ;;  %4081 = vmatmul.mubr.f32.vlgmr.msra.gmra.mxu0 %v709_v4  ;;  %v5074_v4 = vsub.f32 %v1175_v59, %v5057_v61 }
  0xd4   :  { %4095 = vmatpush3.msra.mxu0 %v4902_v40  ;;  %4129 = vmatprep.subr.mxu1 %v4711_v1 }
  0xd5   :  { %4096 = vmatprep.subr.mxu0 %v4711_v1  ;;  %4130 = vmatpush3.msra.mxu1 %v4895_v38  ;;  %v3789_v38 = vld [vmem:[%s5582_s4] ss:$0 sm:$0xff] }
  0xd6   :  { %4097 = vmatpush3.msra.mxu0 %v4913_v42  ;;  %4131 = vmatprep.subr.mxu1 %v4711_v1 }
  0xd7   :  { %4098 = vmatprep.subr.mxu0 %v4711_v1  ;;  %4132 = vmatpush3.msra.mxu1 %v4904_v41 }
  0xd8   :  { %4099 = vmatpush3.msra.mxu0 %v4922_v45  ;;  %4133 = vmatprep.subr.mxu1 %v4711_v1 }
  0xd9   :  { %4100 = vmatprep.subr.mxu0 %v4711_v1  ;;  %4134 = vmatpush3.msra.mxu1 %v4915_v43 }
  0xda   :  { %4135 = vmatprep.mubr.msk.f32.mxu1 %vm4712_vm0, %v4711_v1  ;;  %4101 = vmatpush3.msra.mxu0 %v4930_v47 }
  0xdb   :  { %4102 = vmatprep.mubr.msk.f32.mxu0 %vm4712_vm0, %v4711_v1  ;;  %4136 = vmatmul.mubr.msk.f32.vlgmr.msra.gmra.mxu1 %vm144_vm1, %v3785_v62 }
  0xdc   :  { %4103 = vmatmul.mubr.f32.vlgmr.msra.gmra.mxu0 %v706_v0  ;;  %4116 = vmatprep.subr.mxu0 %v4711_v1  ;;  %v5065_v0 = vsub.f32 %v1177_v54, %v5053_v57 }
  0xdd   :  { %4117 = vmatpush3.msra.mxu0 %v742_v44  ;;  %4124 = vmatprep.mubr.msk.f32.mxu0 %vm4712_vm0, %v4711_v1 }
  0xde   :  { %4118 = vmatprep.subr.mxu0 %v4711_v1  ;;  %4149 = vmatprep.subr.mxu1 %v4711_v1 }
  0xdf   :  { %4119 = vmatpush3.msra.mxu0 %v749_v46  ;;  %4157 = vmatprep.mubr.msk.f32.mxu1 %vm4712_vm0, %v4711_v1 }
  0xe0   :  { %4120 = vmatprep.subr.mxu0 %v4711_v1 }
  0xe1   :  { %4121 = vmatpush3.msra.mxu0 %v756_v49  ;;  %v1138_v49 = vpop.permute.xlu1 %1137 }
  0xe2   :  { %4122 = vmatprep.subr.mxu0 %v4711_v1 }
  0xe3   :  { %4123 = vmatpush3.msra.mxu0 %v763_v51 }
  0xe4   :  { %4125 = vmatmul.mubr.msk.f32.vlgmr.msra.gmra.mxu0 %vm144_vm1, %v3785_v62  ;;  %4138 = vmatprep.subr.mxu0 %v4711_v1  ;;  %v1180_v62 = vsel %vm144_vm1, %v1168_v60, 0 }
  0xe5   :  { %4146 = vmatprep.mubr.msk.f32.mxu0 %vm4712_vm0, %v4711_v1  ;;  %4139 = vmatpush3.msra.mxu0 %v5051_v56  ;;  %v5070_v3 = vand.u32 4294901760, %v1180_v62 }
  0xe6   :  { %4140 = vmatprep.subr.mxu0 %v4711_v1 }
  0xe7   :  { %4141 = vmatpush3.msra.mxu0 %v5053_v57 }
  0xe8   :  { %4142 = vmatprep.subr.mxu0 %v4711_v1 }
  0xe9   :  { %4143 = vmatpush3.msra.mxu0 %v5055_v58 }
  0xea   :  { %4144 = vmatprep.subr.mxu0 %v4711_v1 }
  0xeb   :  { %4145 = vmatpush3.msra.mxu0 %v5057_v61 }
  0xec   :  { %4160 = vmatprep.subr.mxu0 %v4711_v1 }
 0x118   :  { %v223_v5 = vpop.f32.mrf.mxu0 }
 0x11a   :  { %v4016_v6 = vpop.f32.mrf.mxu0 }
 0x11b   :  { %v1295_v6 = vand.u32 4294901760, %v5065_v0 }
 0x11d   :  { %v314_v7 = vpop.f32.mrf.mxu1 }
 0x11e   :  { %v315_v8 = vadd.f32 %v314_v7, %v223_v5  ;;  %v1288_v5 = vand.u32 4294901760, %v5062_v63  ;;  %v1302_v7 = vand.u32 4294901760, %v5068_v2 }
 0x11f   :  { %v4027_v9 = vpop.f32.mrf.mxu1 }
 0x120   :  { %v1309_v9 = vand.u32 4294901760, %v5074_v4 }
 0x123   :  { %v394_v10 = vpop.f32.mrf.mxu0 }
 0x124   :  { %v395_v11 = vadd.f32 %v394_v10, %v315_v8  ;;  %v1252_v8 = vsub.f32 %v1180_v62, %v5070_v3  ;;  %v1289_v10 = vsub.f32 %v5062_v63, %v1288_v5 }
 0x125   :  { %v471_v12 = vpop.f32.mrf.mxu1  ;;  %v4038_v13 = vpop.f32.mrf.mxu0 }
 0x126   :  { %v472_v14 = vadd.f32 %v471_v12, %v395_v11  ;;  %v1296_v11 = vsub.f32 %v5065_v0, %v1295_v6  ;;  %v1303_v12 = vsub.f32 %v5068_v2, %v1302_v7  ;;  %v1253_v13 = vand.u32 4294901760, %v1252_v8 }
 0x127   :  { %v4049_v15 = vpop.f32.mrf.mxu1 }
 0x128   :  { %v1297_v15 = vand.u32 4294901760, %v1296_v11 }
 0x12d   :  { %v554_v16 = vpop.f32.mrf.mxu0 }
 0x12e   :  { %v555_v17 = vadd.f32 %v554_v16, %v472_v14  ;;  %v629_v18 = vpop.f32.mrf.mxu1  ;;  %v1290_v14 = vand.u32 4294901760, %v1289_v10  ;;  %v1310_v16 = vsub.f32 %v5074_v4, %v1309_v9 }
 0x12f   :  { %v4060_v19 = vpop.f32.mrf.mxu0 }
 0x130   :  { %v630_v20 = vadd.f32 %v629_v18, %v555_v17  ;;  %v4071_v21 = vpop.f32.mrf.mxu1  ;;  %v1254_v17 = vsub.f32 %v1252_v8, %v1253_v13  ;;  %4150 = vmatpush3.msra.mxu1 %v1290_v14  ;;  %v1304_v19 = vand.u32 4294901760, %v1303_v12 }
 0x131   :  { %4151 = vmatprep.subr.mxu1 %v4711_v1  ;;  %v1311_v21 = vand.u32 4294901760, %v1310_v16 }
 0x132   :  { %4152 = vmatpush3.msra.mxu1 %v1297_v15 }
 0x133   :  { %4153 = vmatprep.subr.mxu1 %v4711_v1 }
 0x134   :  { %4154 = vmatpush3.msra.mxu1 %v1304_v19 }
 0x135   :  { %4155 = vmatprep.subr.mxu1 %v4711_v1 }
 0x136   :  { %4156 = vmatpush3.msra.mxu1 %v1311_v21 }
 0x137   :  { %4171 = vmatprep.subr.mxu1 %v4711_v1  ;;  %4158 = vmatmul.mubr.f32.vlgmr.msra.gmra.mxu1 %v5070_v3 }
 0x138   :  { %4172 = vmatpush3.msra.mxu1 %v5051_v56  ;;  %4179 = vmatprep.mubr.msk.f32.mxu1 %vm4712_vm0, %v4711_v1 }
 0x139   :  { %4173 = vmatprep.subr.mxu1 %v4711_v1 }
 0x13a   :  { %4174 = vmatpush3.msra.mxu1 %v5053_v57 }
 0x13b   :  { %4175 = vmatprep.subr.mxu1 %v4711_v1 }
 0x13c   :  { %4176 = vmatpush3.msra.mxu1 %v5055_v58 }
 0x13d   :  { %4177 = vmatprep.subr.mxu1 %v4711_v1 }
 0x13e   :  { %4178 = vmatpush3.msra.mxu1 %v5057_v61 }
 0x13f   :  { %4193 = vmatprep.subr.mxu1 %v4711_v1  ;;  %4180 = vmatmul.mubr.f32.vlgmr.msra.gmra.mxu1 %v1253_v13 }
 0x140   :  { %4194 = vmatpush3.msra.mxu1 %v5051_v56  ;;  %4201 = vmatprep.mubr.msk.f32.mxu1 %vm4712_vm0, %v4711_v1 }
 0x141   :  { %4195 = vmatprep.subr.mxu1 %v4711_v1 }
 0x142   :  { %4196 = vmatpush3.msra.mxu1 %v5053_v57 }
 0x143   :  { %4197 = vmatprep.subr.mxu1 %v4711_v1 }
 0x144   :  { %4198 = vmatpush3.msra.mxu1 %v5055_v58 }
 0x145   :  { %4199 = vmatprep.subr.mxu1 %v4711_v1 }
 0x146   :  { %4200 = vmatpush3.msra.mxu1 %v5057_v61 }
 0x147   :  { %4215 = vmatprep.subr.mxu1 %v4711_v1  ;;  %4202 = vmatmul.mubr.f32.vlgmr.msra.gmra.mxu1 %v5070_v3 }
 0x148   :  { %4223 = vmatprep.mubr.msk.f32.mxu1 %vm4712_vm0, %v4711_v1 }
 0x18a   :  { %v802_v22 = vpop.f32.mrf.mxu1 }
 0x18c   :  { %v4093_v23 = vpop.f32.mrf.mxu1 }
 0x18d   :  { %v1173_v23 = vld [vmem:[#allocation8 + $0x10] sm:$0xff] }
 0x192   :  { %v959_v24 = vpop.f32.mrf.mxu1 }
 0x193   :  { %v711_v25 = vpop.f32.mrf.mxu0 }
 0x194   :  { %v4115_v26 = vpop.f32.mrf.mxu1  ;;  %v712_v28 = vadd.f32 %v711_v25, %v630_v20  ;;  %v1255_v20 = vand.u32 4294901760, %v1254_v17  ;;  %v1172_v25 = vld [vmem:[#allocation8 + $0x8] sm:$0xff] }
 0x195   :  { %v4082_v27 = vpop.f32.mrf.mxu0  ;;  %v5111_v26 = vand.u32 4294901760, %v1173_v23 }
 0x196   :  { %v803_v31 = vadd.f32 %v802_v22, %v712_v28  ;;  %4147 = vmatmul.mubr.f32.vlgmr.msra.gmra.mxu0 %v1255_v20  ;;  %v1174_v22 = vld [vmem:[#allocation8 + $0x18] sm:$0xff]  ;;  %v5120_v28 = vand.u32 4294901760, %v1172_v25 }
 0x197   :  { %4161 = vmatpush3.msra.mxu0 %v5062_v63  ;;  %4168 = vmatprep.mubr.msk.f32.mxu0 %vm4712_vm0, %v4711_v1 }
 0x198   :  { %4162 = vmatprep.subr.mxu0 %v4711_v1 }
 0x199   :  { %4163 = vmatpush3.msra.mxu0 %v5065_v0 }
 0x19a   :  { %4164 = vmatprep.subr.mxu0 %v4711_v1 }
 0x19b   :  { %v1117_v29 = vpop.f32.mrf.mxu1  ;;  %4165 = vmatpush3.msra.mxu0 %v5068_v2 }
 0x19c   :  { %v882_v30 = vpop.f32.mrf.mxu0  ;;  %4166 = vmatprep.subr.mxu0 %v4711_v1 }
 0x19d   :  { %v4137_v32 = vpop.f32.mrf.mxu1  ;;  %v883_v34 = vadd.f32 %v882_v30, %v803_v31  ;;  %4167 = vmatpush3.msra.mxu0 %v5074_v4  ;;  %v5136_v31 = vsub.f32 %v1172_v25, %v5120_v28 }
 0x19e   :  { %v4104_v33 = vpop.f32.mrf.mxu0  ;;  %4182 = vmatprep.subr.mxu0 %v4711_v1  ;;  %4169 = vmatmul.mubr.f32.vlgmr.msra.gmra.mxu0 %v1252_v8 }
 0x19f   :  { %v960_v35 = vadd.f32 %v959_v24, %v883_v34  ;;  %v5105_v24 = vand.u32 4294901760, %v1174_v22  ;;  %4183 = vmatpush3.msra.mxu0 %v1288_v5  ;;  %v1789_v34 = vand.u32 4294901760, %v5136_v31  ;;  %4190 = vmatprep.mubr.msk.f32.mxu0 %vm4712_vm0, %v4711_v1 }
 0x1a0   :  { %4184 = vmatprep.subr.mxu0 %v4711_v1 }
 0x1a1   :  { %v5118_v27 = vsub.f32 %v1174_v22, %v5105_v24  ;;  %4185 = vmatpush3.msra.mxu0 %v1295_v6 }
 0x1a2   :  { %4186 = vmatprep.subr.mxu0 %v4711_v1 }
 0x1a3   :  { %v1775_v30 = vand.u32 4294901760, %v5118_v27  ;;  %4187 = vmatpush3.msra.mxu0 %v1302_v7 }
 0x1a4   :  { %v1042_v36 = vpop.f32.mrf.mxu0  ;;  %4188 = vmatprep.subr.mxu0 %v4711_v1 }
 0x1a5   :  { %v1043_v37 = vadd.f32 %v1042_v36, %v960_v35  ;;  %v1776_v33 = vsub.f32 %v5118_v27, %v1775_v30  ;;  %4189 = vmatpush3.msra.mxu0 %v1309_v9 }
 0x1a6   :  { %v4126_v39 = vpop.f32.mrf.mxu0  ;;  %4191 = vmatmul.mubr.f32.vlgmr.msra.gmra.mxu0 %v5070_v3  ;;  %4204 = vmatprep.subr.mxu0 %v4711_v1 }
 0x1a7   :  { %v1118_v40 = vadd.f32 %v1117_v29, %v1043_v37  ;;  %v5128_v29 = vsub.f32 %v1173_v23, %v5111_v26  ;;  %v1777_v36 = vand.u32 4294901760, %v1776_v33  ;;  %v1790_v37 = vsub.f32 %v5136_v31, %v1789_v34  ;;  %4205 = vmatpush3.msra.mxu0 %v5105_v24  ;;  %4212 = vmatprep.mubr.msk.f32.mxu0 %vm4712_vm0, %v4711_v1 }
 0x1a8   :  { %4206 = vmatprep.subr.mxu0 %v4711_v1 }
 0x1a9   :  { %v1128_v41 = vadd.f32 %v3789_v38, %v1118_v40  ;;  %v1782_v32 = vand.u32 4294901760, %v5128_v29  ;;  %4216 = vmatpush3.msra.mxu1 %v1777_v36  ;;  %v1791_v39 = vand.u32 4294901760, %v1790_v37  ;;  %4207 = vmatpush3.msra.mxu0 %v5111_v26  ;;  %v1171_v40 = vld [vmem:[#allocation8] sm:$0xff] }
 0x1aa   :  { %4217 = vmatprep.subr.mxu1 %v4711_v1  ;;  %4208 = vmatprep.subr.mxu0 %v4711_v1 }
 0x1ab   :  { %4486 = vtanh.f32 %v1128_v41  ;;  %v3790_v43 = vmul.f32 -1.442695, %v1128_v41  ;;  %v1783_v35 = vsub.f32 %v5128_v29, %v1782_v32  ;;  %4209 = vmatpush3.msra.mxu0 %v5120_v28  ;;  %v5187_v41 = vand.u32 4294901760, %v1171_v40 }
 0x1ac   :  { %4210 = vmatprep.subr.mxu0 %v4711_v1 }
 0x1ad   :  { %4488 = vpow2.f32 %v3790_v43  ;;  %v1784_v38 = vand.u32 4294901760, %v1783_v35  ;;  %4211 = vmatpush3.msra.mxu0 %v5187_v41 }
 0x1ae   :  { %4226 = vmatprep.subr.mxu0 %v4711_v1 }
 0x1af   :  { %4218 = vmatpush3.msra.mxu1 %v1784_v38 }
 0x1b0   :  { %4219 = vmatprep.subr.mxu1 %v4711_v1 }
 0x1b1   :  { %4220 = vmatpush3.msra.mxu1 %v1791_v39 }
 0x1b2   :  { %4221 = vmatprep.subr.mxu1 %v4711_v1 }
 0x1b8   :  { %v4487_v42 = vpop.eup %4486 }
 0x1b9   :  { %1142 = vrot.lane.b32.xlu0 %v4487_v42, %s4714_s23  ;;  %v5190_v42 = vsub.f32 %v1171_v40, %v5187_v41 }
 0x1ba   :  { %v4489_v44 = vpop.eup %4488 }
 0x1bb   :  { %v1132_v45 = vadd.f32 1.0, %v4489_v44  ;;  %v1796_v43 = vand.u32 4294901760, %v5190_v42 }
 0x1bd   :  { %4490 = vrcp.f32 %v1132_v45  ;;  %v1797_v44 = vsub.f32 %v5190_v42, %v1796_v43 }
 0x1bf   :  { %v1798_v45 = vand.u32 4294901760, %v1797_v44  ;;  %v2211_v44 = vld [vmem:[#allocation10 + $0x28] sm:$0xff] }
 0x1c1   :  { %4222 = vmatpush3.msra.mxu1 %v1798_v45 }
 0x1c2   :  { %4237 = vmatprep.subr.mxu1 %v4711_v1 }
 0x1ca   :  { %v5043_v46 = vpop.eup %4490 }
 0x1cb   :  { %v1140_v50 = vmul.f32 %v5043_v46, %v1138_v49  ;;  %v1170_v49 = vld [vmem:[#allocation5 + $0x8] sm:$0xff] }
 0x1f7   :  { %v1348_v53 = vpop.f32.mrf.mxu1 }
 0x1f9   :  { %v4159_v55 = vpop.f32.mrf.mxu1 }
 0x1ff   :  { %v1505_v59 = vpop.f32.mrf.mxu1 }
 0x201   :  { %v4181_v61 = vpop.f32.mrf.mxu1 }
 0x207   :  { %v1663_v0 = vpop.f32.mrf.mxu1 }
 0x209   :  { %v4203_v3 = vpop.f32.mrf.mxu1 }
 0x22b   :  { %v1143_v47 = vpop.permute.xlu0 %1142 }
 0x22c   :  { %v1145_v48 = vmul.f32 %v5043_v46, %v1143_v47 }
 0x22e   :  { %1147 = vrot.lane.b32.xlu1 %v1145_v48, %s4713_s0 }
 0x2a0   :  { %v1148_v51 = vpop.permute.xlu1 %1147 }
 0x2a1   :  { %v5048_v52 = vadd.f32 %v1148_v51, %v1140_v50  ;;  %v1257_v50 = vpop.f32.mrf.mxu0 }
 0x2a2   :  { %v1349_v54 = vadd.f32 %v1348_v53, %v1257_v50  ;;  %v2203_v50 = vld [vmem:[#allocation2 + $0x10] sm:$0xff] }
 0x2a3   :  { %4492 = vtanh.f32 %v5048_v52  ;;  %v4148_v51 = vpop.f32.mrf.mxu0  ;;  %v2215_v53 = vsel %vm144_vm1, %v2203_v50, 0 }
 0x2a5   :  { %v1428_v56 = vpop.f32.mrf.mxu0 }
 0x2a6   :  { %v1429_v57 = vadd.f32 %v1428_v56, %v1349_v54 }
 0x2a7   :  { %v4170_v58 = vpop.f32.mrf.mxu0 }
 0x2a8   :  { %v1506_v60 = vadd.f32 %v1505_v59, %v1429_v57  ;;  %v5283_v57 = vand.u32 4294901760, %v2215_v53 }
 0x2a9   :  { %v1588_v62 = vpop.f32.mrf.mxu0 }
 0x2aa   :  { %v1589_v63 = vadd.f32 %v1588_v62, %v1506_v60  ;;  %v2287_v62 = vsub.f32 %v2215_v53, %v5283_v57 }
 0x2ac   :  { %v1664_v2 = vadd.f32 %v1663_v0, %v1589_v63  ;;  %v2288_v3 = vand.u32 4294901760, %v2287_v62 }
 0x2b0   :  { %v4493_v18 = vpop.eup %4492 }
 0x2b1   :  { %1153 = vrot.lane.b32.xlu0 %v4493_v18, %s4714_s23 }
 0x323   :  { %v1154_v47 = vpop.permute.xlu0 %1153 }
 0x324   :  { %v1156_v48 = vmul.f32 %v5043_v46, %v1154_v47  ;;  %v4192_v46 = vpop.f32.mrf.mxu0 }
 0x326   :  { %1158 = vrot.lane.b32.xlu1 %v1156_v48, %s4713_s0  ;;  %v5268_v48 = vand.u32 4294901760, %v2211_v44 }
 0x328   :  { %v5281_v56 = vsub.f32 %v2211_v44, %v5268_v48 }
 0x32a   :  { %2170 = vrot.lane.b32.xlu1 %v1170_v49, %s4713_s0  ;;  %v2210_v49 = vld [vmem:[#allocation10 + $0x20] sm:$0xff]  ;;  %v2337_v61 = vand.u32 4294901760, %v5281_v56 }
 0x32b   :  { %v5270_v51 = vand.u32 4294901760, %v2210_v49 }
 0x32d   :  { %v5287_v58 = vsub.f32 %v2210_v49, %v5270_v51 }
 0x32f   :  { %v2344_v63 = vand.u32 4294901760, %v5287_v58 }
 0x398   :  { %v1159_v4 = vpop.permute.xlu1 %1158 }
 0x399   :  { %1161 = vst.msk [vmem:[#allocation14] sm:$0xff] %vm144_vm1, %v1159_v4  ;;  %v1667_v5 = vsel %vm144_vm1, %v1159_v4, 0 }
 0x39a   :  { %v1738_v6 = vand.u32 4294901760, %v1667_v5 }
 0x39c   :  { %v1739_v7 = vsub.f32 %v1667_v5, %v1738_v6  ;;  %4224 = vmatmul.mubr.f32.vlgmr.msra.gmra.mxu1 %v1738_v6  ;;  %v2171_v38 = vpop.permute.xlu1 %2170 }
 0x39d   :  { %4238 = vmatpush3.msra.mxu1 %v5105_v24  ;;  %4245 = vmatprep.mubr.msk.f32.mxu1 %vm4712_vm0, %v4711_v1 }
 0x39e   :  { %v1740_v8 = vand.u32 4294901760, %v1739_v7  ;;  %4239 = vmatprep.subr.mxu1 %v4711_v1 }
 0x39f   :  { %4240 = vmatpush3.msra.mxu1 %v5111_v26 }
 0x3a0   :  { %v1741_v9 = vsub.f32 %v1739_v7, %v1740_v8  ;;  %4241 = vmatprep.subr.mxu1 %v4711_v1 }
 0x3a1   :  { %4242 = vmatpush3.msra.mxu1 %v5120_v28 }
 0x3a2   :  { %4243 = vmatprep.subr.mxu1 %v4711_v1  ;;  %v1742_v10 = vand.u32 4294901760, %v1741_v9 }
 0x3a3   :  { %4244 = vmatpush3.msra.mxu1 %v5187_v41 }
 0x3a4   :  { %4246 = vmatmul.mubr.f32.vlgmr.msra.gmra.mxu1 %v1740_v8  ;;  %4259 = vmatprep.subr.mxu1 %v4711_v1 }
 0x3a5   :  { %4213 = vmatmul.mubr.f32.vlgmr.msra.gmra.mxu0 %v1742_v10  ;;  %4260 = vmatpush3.msra.mxu1 %v5105_v24 }
 0x3a6   :  { %4227 = vmatpush3.msra.mxu0 %v5118_v27  ;;  %4261 = vmatprep.subr.mxu1 %v4711_v1  ;;  %v3791_v27 = vld [vmem:[%s5584_s6] ss:$0 sm:$0xff] }
 0x3a7   :  { %4228 = vmatprep.subr.mxu0 %v4711_v1  ;;  %4262 = vmatpush3.msra.mxu1 %v5111_v26 }
 0x3a8   :  { %4229 = vmatpush3.msra.mxu0 %v5128_v29  ;;  %4263 = vmatprep.subr.mxu1 %v4711_v1 }
 0x3a9   :  { %4230 = vmatprep.subr.mxu0 %v4711_v1  ;;  %4264 = vmatpush3.msra.mxu1 %v5120_v28 }
 0x3aa   :  { %4231 = vmatpush3.msra.mxu0 %v5136_v31  ;;  %4265 = vmatprep.subr.mxu1 %v4711_v1 }
 0x3ab   :  { %4232 = vmatprep.subr.mxu0 %v4711_v1  ;;  %4234 = vmatprep.mubr.msk.f32.mxu0 %vm4712_vm0, %v4711_v1 }
 0x3ac   :  { %4233 = vmatpush3.msra.mxu0 %v5190_v42  ;;  %4266 = vmatpush3.msra.mxu1 %v5187_v41  ;;  %v2213_v42 = vld [vmem:[#allocation10 + $0x38] sm:$0xff] }
 0x3ad   :  { %4267 = vmatprep.mubr.msk.f32.mxu1 %vm4712_vm0, %v4711_v1  ;;  %4235 = vmatmul.mubr.f32.vlgmr.msra.gmra.mxu0 %v1739_v7  ;;  %v5264_v45 = vand.u32 4294901760, %v2213_v42  ;;  %v2289_v7 = vsub.f32 %v2287_v62, %v2288_v3 }
 0x3ae   :  { %4248 = vmatprep.subr.mxu0 %v4711_v1  ;;  %4268 = vmatmul.mubr.f32.vlgmr.msra.gmra.mxu1 %v1738_v6 }
 0x3af   :  { %4249 = vmatpush3.msra.mxu0 %v1775_v30  ;;  %4256 = vmatprep.mubr.msk.f32.mxu0 %vm4712_vm0, %v4711_v1  ;;  %v5275_v54 = vsub.f32 %v2213_v42, %v5264_v45  ;;  %v2290_v10 = vand.u32 4294901760, %v2289_v7 }
 0x3b0   :  { %4250 = vmatprep.subr.mxu0 %v4711_v1  ;;  %4281 = vmatprep.subr.mxu1 %v4711_v1 }
 0x3b1   :  { %4251 = vmatpush3.msra.mxu0 %v1782_v32  ;;  %4289 = vmatprep.mubr.msk.f32.mxu1 %vm4712_vm0, %v4711_v1  ;;  %v2323_v59 = vand.u32 4294901760, %v5275_v54 }
 0x3b2   :  { %4252 = vmatprep.subr.mxu0 %v4711_v1 }
 0x3b3   :  { %4253 = vmatpush3.msra.mxu0 %v1789_v34  ;;  %v2324_v0 = vsub.f32 %v5275_v54, %v2323_v59 }
 0x3b4   :  { %4254 = vmatprep.subr.mxu0 %v4711_v1 }
 0x3b5   :  { %4255 = vmatpush3.msra.mxu0 %v1796_v43  ;;  %v2212_v43 = vld [vmem:[#allocation10 + $0x30] sm:$0xff]  ;;  %v2325_v4 = vand.u32 4294901760, %v2324_v0 }
 0x3b6   :  { %4257 = vmatmul.mubr.f32.vlgmr.msra.gmra.mxu0 %v1738_v6  ;;  %4270 = vmatprep.subr.mxu0 %v4711_v1  ;;  %v5266_v47 = vand.u32 4294901760, %v2212_v43  ;;  %v2345_v6 = vsub.f32 %v5287_v58, %v2344_v63 }
 0x3b7   :  { %4278 = vmatprep.mubr.msk.f32.mxu0 %vm4712_vm0, %v4711_v1  ;;  %4271 = vmatpush3.msra.mxu0 %v5264_v45 }
 0x3b8   :  { %v5278_v55 = vsub.f32 %v2212_v43, %v5266_v47  ;;  %4272 = vmatprep.subr.mxu0 %v4711_v1  ;;  %4282 = vmatpush3.msra.mxu1 %v2325_v4 }
 0x3b9   :  { %4273 = vmatpush3.msra.mxu0 %v5266_v47  ;;  %4283 = vmatprep.subr.mxu1 %v4711_v1 }
 0x3ba   :  { %v2330_v60 = vand.u32 4294901760, %v5278_v55  ;;  %4274 = vmatprep.subr.mxu0 %v4711_v1 }
 0x3bb   :  { %4275 = vmatpush3.msra.mxu0 %v5268_v48 }
 0x3bc   :  { %v2331_v46 = vsub.f32 %v5278_v55, %v2330_v60  ;;  %4276 = vmatprep.subr.mxu0 %v4711_v1 }
 0x3bd   :  { %4277 = vmatpush3.msra.mxu0 %v5270_v51 }
 0x3be   :  { %v2332_v5 = vand.u32 4294901760, %v2331_v46  ;;  %4292 = vmatprep.subr.mxu0 %v4711_v1  ;;  %4279 = vmatmul.mubr.f32.vlgmr.msra.gmra.mxu0 %v2290_v10 }
 0x3bf   :  { %4293 = vmatpush3.msra.mxu0 %v5275_v54  ;;  %4300 = vmatprep.mubr.msk.f32.mxu0 %vm4712_vm0, %v4711_v1 }
 0x3c0   :  { %4284 = vmatpush3.msra.mxu1 %v2332_v5  ;;  %4294 = vmatprep.subr.mxu0 %v4711_v1 }
 0x3c1   :  { %4285 = vmatprep.subr.mxu1 %v4711_v1  ;;  %4295 = vmatpush3.msra.mxu0 %v5278_v55 }
 0x3c2   :  { %4296 = vmatprep.subr.mxu0 %v4711_v1 }
 0x3c3   :  { %4297 = vmatpush3.msra.mxu0 %v5281_v56 }
 0x3c4   :  { %4298 = vmatprep.subr.mxu0 %v4711_v1 }
 0x3c5   :  { %4299 = vmatpush3.msra.mxu0 %v5287_v58 }
 0x3c6   :  { %4314 = vmatprep.subr.mxu0 %v4711_v1  ;;  %4301 = vmatmul.mubr.f32.vlgmr.msra.gmra.mxu0 %v2287_v62 }
 0x3c7   :  { %4315 = vmatpush3.msra.mxu0 %v2323_v59  ;;  %4322 = vmatprep.mubr.msk.f32.mxu0 %vm4712_vm0, %v4711_v1 }
 0x3c8   :  { %4316 = vmatprep.subr.mxu0 %v4711_v1 }
 0x3c9   :  { %4317 = vmatpush3.msra.mxu0 %v2330_v60 }
 0x3ca   :  { %4318 = vmatprep.subr.mxu0 %v4711_v1 }
 0x3cb   :  { %4319 = vmatpush3.msra.mxu0 %v2337_v61 }
 0x3cc   :  { %4320 = vmatprep.subr.mxu0 %v4711_v1 }
 0x3cd   :  { %4321 = vmatpush3.msra.mxu0 %v2344_v63 }
 0x3ce   :  { %4323 = vmatmul.mubr.f32.vlgmr.msra.gmra.mxu0 %v5283_v57  ;;  %4336 = vmatprep.subr.mxu0 %v4711_v1 }
 0x3cf   :  { %4344 = vmatprep.mubr.msk.f32.mxu0 %vm4712_vm0, %v4711_v1 }
 0x45c   :  { %v1835_v11 = vpop.f32.mrf.mxu1 }
 0x45e   :  { %v4225_v12 = vpop.f32.mrf.mxu1 }
 0x45f   :  { %v2209_v12 = vld [vmem:[#allocation10 + $0x18] sm:$0xff] }
 0x464   :  { %v1992_v13 = vpop.f32.mrf.mxu1 }
 0x465   :  { %v1744_v14 = vpop.f32.mrf.mxu0 }
 0x466   :  { %v4247_v15 = vpop.f32.mrf.mxu1  ;;  %v1745_v17 = vadd.f32 %v1744_v14, %v1664_v2  ;;  %v2338_v2 = vsub.f32 %v5281_v56, %v2337_v61  ;;  %v5318_v14 = vand.u32 4294901760, %v2209_v12 }
 0x467   :  { %v4214_v16 = vpop.f32.mrf.mxu0  ;;  %v2207_v15 = vld [vmem:[#allocation10 + $0x8] sm:$0xff] }
 0x468   :  { %v1836_v20 = vadd.f32 %v1835_v11, %v1745_v17  ;;  %v2339_v9 = vand.u32 4294901760, %v2338_v2  ;;  %v2346_v11 = vand.u32 4294901760, %v2345_v6  ;;  %v5331_v17 = vsub.f32 %v2209_v12, %v5318_v14  ;;  %4337 = vmatpush3.msra.mxu0 %v5318_v14 }
 0x469   :  { %4338 = vmatprep.subr.mxu0 %v4711_v1 }
 0x46a   :  { %4286 = vmatpush3.msra.mxu1 %v2339_v9 }
 0x46b   :  { %4287 = vmatprep.subr.mxu1 %v4711_v1 }
 0x46c   :  { %4288 = vmatpush3.msra.mxu1 %v2346_v11 }
 0x46d   :  { %v1915_v18 = vpop.f32.mrf.mxu0  ;;  %4303 = vmatprep.subr.mxu1 %v4711_v1  ;;  %4290 = vmatmul.mubr.f32.vlgmr.msra.gmra.mxu1 %v5283_v57 }
 0x46e   :  { %v2150_v19 = vpop.f32.mrf.mxu1  ;;  %v1916_v23 = vadd.f32 %v1915_v18, %v1836_v20  ;;  %4304 = vmatpush3.msra.mxu1 %v5264_v45  ;;  %v5333_v18 = vand.u32 4294901760, %v2207_v15  ;;  %4311 = vmatprep.mubr.msk.f32.mxu1 %vm4712_vm0, %v4711_v1  ;;  %v2810_v20 = vand.u32 4294901760, %v5331_v17 }
 0x46f   :  { %v4236_v21 = vpop.f32.mrf.mxu0  ;;  %4305 = vmatprep.subr.mxu1 %v4711_v1 }
 0x470   :  { %v4269_v22 = vpop.f32.mrf.mxu1  ;;  %v1993_v24 = vadd.f32 %v1992_v13, %v1916_v23  ;;  %v2208_v13 = vld [vmem:[#allocation10 + $0x10] sm:$0xff]  ;;  %4306 = vmatpush3.msra.mxu1 %v5266_v47  ;;  %v5349_v21 = vsub.f32 %v2207_v15, %v5333_v18  ;;  %v2811_v23 = vsub.f32 %v5331_v17, %v2810_v20 }
 0x471   :  { %v5324_v16 = vand.u32 4294901760, %v2208_v13  ;;  %4307 = vmatprep.subr.mxu1 %v4711_v1 }
 0x472   :  { %4308 = vmatpush3.msra.mxu1 %v5268_v48 }
 0x473   :  { %4309 = vmatprep.subr.mxu1 %v4711_v1  ;;  %4339 = vmatpush3.msra.mxu0 %v5324_v16 }
 0x474   :  { %4310 = vmatpush3.msra.mxu1 %v5270_v51  ;;  %4340 = vmatprep.subr.mxu0 %v4711_v1 }
 0x475   :  { %4325 = vmatprep.subr.mxu1 %v4711_v1  ;;  %4312 = vmatmul.mubr.f32.vlgmr.msra.gmra.mxu1 %v2288_v3 }
 0x476   :  { %v2075_v25 = vpop.f32.mrf.mxu0  ;;  %4326 = vmatpush3.msra.mxu1 %v5264_v45  ;;  %4333 = vmatprep.mubr.msk.f32.mxu1 %vm4712_vm0, %v4711_v1 }
 0x477   :  { %v2076_v26 = vadd.f32 %v2075_v25, %v1993_v24  ;;  %4327 = vmatprep.subr.mxu1 %v4711_v1  ;;  %v2824_v24 = vand.u32 4294901760, %v5349_v21  ;;  %4341 = vmatpush3.msra.mxu0 %v5333_v18 }
 0x478   :  { %v4258_v28 = vpop.f32.mrf.mxu0  ;;  %4328 = vmatpush3.msra.mxu1 %v5266_v47  ;;  %4342 = vmatprep.subr.mxu0 %v4711_v1 }
 0x479   :  { %v2151_v29 = vadd.f32 %v2150_v19, %v2076_v26  ;;  %v5341_v19 = vsub.f32 %v2208_v13, %v5324_v16  ;;  %4329 = vmatprep.subr.mxu1 %v4711_v1  ;;  %v2812_v26 = vand.u32 4294901760, %v2811_v23 }
 0x47a   :  { %4330 = vmatpush3.msra.mxu1 %v5268_v48 }
 0x47b   :  { %v2161_v30 = vadd.f32 %v3791_v27, %v2151_v29  ;;  %v2817_v22 = vand.u32 4294901760, %v5341_v19  ;;  %4331 = vmatprep.subr.mxu1 %v4711_v1  ;;  %v2825_v27 = vsub.f32 %v5349_v21, %v2824_v24 }
 0x47c   :  { %4332 = vmatpush3.msra.mxu1 %v5270_v51 }
 0x47d   :  { %4494 = vtanh.f32 %v2161_v30  ;;  %v3792_v32 = vmul.f32 -1.442695, %v2161_v30  ;;  %v2818_v25 = vsub.f32 %v5341_v19, %v2817_v22  ;;  %4347 = vmatprep.subr.mxu1 %v4711_v1  ;;  %4334 = vmatmul.mubr.f32.vlgmr.msra.gmra.mxu1 %v5283_v57  ;;  %v2826_v29 = vand.u32 4294901760, %v2825_v27  ;;  %v2206_v30 = vld [vmem:[#allocation10] sm:$0xff] }
 0x47e   :  { %4348 = vmatpush3.msra.mxu1 %v2812_v26  ;;  %4355 = vmatprep.mubr.msk.f32.mxu1 %vm4712_vm0, %v4711_v1 }
 0x47f   :  { %4496 = vpow2.f32 %v3792_v32  ;;  %v2819_v28 = vand.u32 4294901760, %v2818_v25  ;;  %4349 = vmatprep.subr.mxu1 %v4711_v1 }
 0x481   :  { %4350 = vmatpush3.msra.mxu1 %v2819_v28 }
 0x482   :  { %4351 = vmatprep.subr.mxu1 %v4711_v1 }
 0x483   :  { %4352 = vmatpush3.msra.mxu1 %v2826_v29 }
 0x484   :  { %4353 = vmatprep.subr.mxu1 %v4711_v1 }
 0x48a   :  { %v4495_v31 = vpop.eup %4494 }
 0x48b   :  { %2175 = vrot.lane.b32.xlu0 %v4495_v31, %s4714_s23  ;;  %v5400_v31 = vand.u32 4294901760, %v2206_v30 }
 0x48c   :  { %v4497_v33 = vpop.eup %4496 }
 0x48d   :  { %v2165_v34 = vadd.f32 1.0, %v4497_v33  ;;  %v5403_v32 = vsub.f32 %v2206_v30, %v5400_v31  ;;  %4343 = vmatpush3.msra.mxu0 %v5400_v31 }
 0x48e   :  { %4358 = vmatprep.subr.mxu0 %v4711_v1 }
 0x48f   :  { %4498 = vrcp.f32 %v2165_v34  ;;  %v2831_v33 = vand.u32 4294901760, %v5403_v32 }
 0x491   :  { %v2832_v34 = vsub.f32 %v5403_v32, %v2831_v33 }
 0x49c   :  { %v5256_v35 = vpop.eup %4498 }
 0x49d   :  { %v2173_v39 = vmul.f32 %v5256_v35, %v2171_v38 }
 0x4fd   :  { %v2176_v36 = vpop.permute.xlu0 %2175 }
 0x4fe   :  { %v2178_v37 = vmul.f32 %v5256_v35, %v2176_v36  ;;  %v2833_v36 = vand.u32 4294901760, %v2832_v34  ;;  %v3239_v34 = vld [vmem:[#allocation11 + $0x10] sm:$0xff] }
 0x500   :  { %2180 = vrot.lane.b32.xlu0 %v2178_v37, %s4713_s0  ;;  %4354 = vmatpush3.msra.mxu1 %v2833_v36  ;;  %v3238_v36 = vld [vmem:[#allocation11 + $0x8] sm:$0xff] }
 0x501   :  { %4369 = vmatprep.subr.mxu1 %v4711_v1 }
 0x52d   :  { %v2383_v43 = vpop.f32.mrf.mxu1 }
 0x52f   :  { %v4291_v45 = vpop.f32.mrf.mxu1 }
 0x535   :  { %v2540_v50 = vpop.f32.mrf.mxu1 }
 0x537   :  { %v4313_v53 = vpop.f32.mrf.mxu1 }
 0x53d   :  { %v2698_v56 = vpop.f32.mrf.mxu1 }
 0x53f   :  { %v4335_v58 = vpop.f32.mrf.mxu1 }
 0x572   :  { %v2181_v40 = vpop.permute.xlu0 %2180 }
 0x573   :  { %v5261_v41 = vadd.f32 %v2181_v40, %v2173_v39  ;;  %v2205_v39 = vld [vmem:[#allocation5 + $0x10] sm:$0xff]  ;;  %v2292_v40 = vpop.f32.mrf.mxu0 }
 0x574   :  { %v2384_v44 = vadd.f32 %v2383_v43, %v2292_v40 }
 0x575   :  { %4500 = vtanh.f32 %v5261_v41  ;;  %v4280_v42 = vpop.f32.mrf.mxu0 }
 0x577   :  { %v2463_v47 = vpop.f32.mrf.mxu0 }
 0x578   :  { %v2464_v48 = vadd.f32 %v2463_v47, %v2384_v44 }
 0x579   :  { %v4302_v49 = vpop.f32.mrf.mxu0 }
 0x57a   :  { %v2541_v51 = vadd.f32 %v2540_v50, %v2464_v48 }
 0x57b   :  { %v2623_v54 = vpop.f32.mrf.mxu0 }
 0x57c   :  { %v2624_v55 = vadd.f32 %v2623_v54, %v2541_v51 }
 0x57e   :  { %v2699_v57 = vadd.f32 %v2698_v56, %v2624_v55  ;;  %v3237_v56 = vld [vmem:[#allocation11] sm:$0xff] }
 0x582   :  { %v4501_v8 = vpop.eup %4500 }
 0x583   :  { %2186 = vrot.lane.b32.xlu1 %v4501_v8, %s4714_s23 }
 0x5f5   :  { %v2187_v37 = vpop.permute.xlu1 %2186 }
 0x5f6   :  { %v2189_v38 = vmul.f32 %v5256_v35, %v2187_v37  ;;  %v4324_v35 = vpop.f32.mrf.mxu0 }
 0x5f7   :  { %v3284_v35 = vand.u32 4294901760, %v3237_v56 }
 0x5f8   :  { %2191 = vrot.lane.b32.xlu0 %v2189_v38, %s4713_s0  ;;  %v5472_v38 = vand.u32 4294901760, %v3239_v34 }
 0x5fa   :  { %v5480_v42 = vsub.f32 %v3239_v34, %v5472_v38 }
 0x5fc   :  { %3205 = vrot.lane.b32.xlu0 %v2205_v39, %s4713_s0  ;;  %v5474_v39 = vand.u32 4294901760, %v3238_v36  ;;  %v3363_v47 = vand.u32 4294901760, %v5480_v42 }
 0x5fe   :  { %v5483_v43 = vsub.f32 %v3238_v36, %v5474_v39  ;;  %v3364_v50 = vsub.f32 %v5480_v42, %v3363_v47 }
 0x600   :  { %v3370_v48 = vand.u32 4294901760, %v5483_v43  ;;  %v3365_v54 = vand.u32 4294901760, %v3364_v50 }
 0x602   :  { %v3371_v51 = vsub.f32 %v5483_v43, %v3370_v48 }
 0x604   :  { %v3372_v55 = vand.u32 4294901760, %v3371_v51 }
 0x66a   :  { %v2192_v59 = vpop.permute.xlu0 %2191 }
 0x66b   :  { %2195 = vst.msk [vmem:[#allocation14 + $0x8] sm:$0xff] %vm144_vm1, %v2192_v59  ;;  %v2702_v60 = vsel %vm144_vm1, %v2192_v59, 0 }
 0x66c   :  { %v2773_v61 = vand.u32 4294901760, %v2702_v60 }
 0x66e   :  { %v2774_v62 = vsub.f32 %v2702_v60, %v2773_v61  ;;  %4356 = vmatmul.mubr.f32.vlgmr.msra.gmra.mxu1 %v2773_v61  ;;  %v3206_v29 = vpop.permute.xlu0 %3205 }
 0x66f   :  { %4370 = vmatpush3.msra.mxu1 %v5318_v14  ;;  %4377 = vmatprep.mubr.msk.f32.mxu1 %vm4712_vm0, %v4711_v1 }
 0x670   :  { %v2775_v63 = vand.u32 4294901760, %v2774_v62  ;;  %4371 = vmatprep.subr.mxu1 %v4711_v1 }
 0x671   :  { %4372 = vmatpush3.msra.mxu1 %v5324_v16 }
 0x672   :  { %v2776_v0 = vsub.f32 %v2774_v62, %v2775_v63  ;;  %4373 = vmatprep.subr.mxu1 %v4711_v1 }
 0x673   :  { %4374 = vmatpush3.msra.mxu1 %v5333_v18 }
 0x674   :  { %4375 = vmatprep.subr.mxu1 %v4711_v1  ;;  %v2777_v46 = vand.u32 4294901760, %v2776_v0 }
 0x675   :  { %4376 = vmatpush3.msra.mxu1 %v5400_v31 }
 0x676   :  { %4378 = vmatmul.mubr.f32.vlgmr.msra.gmra.mxu1 %v2775_v63  ;;  %4391 = vmatprep.subr.mxu1 %v4711_v1 }
 0x677   :  { %4345 = vmatmul.mubr.f32.vlgmr.msra.gmra.mxu0 %v2777_v46  ;;  %4392 = vmatpush3.msra.mxu1 %v5318_v14 }
 0x678   :  { %4359 = vmatpush3.msra.mxu0 %v5331_v17  ;;  %4393 = vmatprep.subr.mxu1 %v4711_v1 }
 0x679   :  { %4360 = vmatprep.subr.mxu0 %v4711_v1  ;;  %4394 = vmatpush3.msra.mxu1 %v5324_v16 }
 0x67a   :  { %4361 = vmatpush3.msra.mxu0 %v5341_v19  ;;  %4395 = vmatprep.subr.mxu1 %v4711_v1 }
 0x67b   :  { %4362 = vmatprep.subr.mxu0 %v4711_v1  ;;  %4396 = vmatpush3.msra.mxu1 %v5333_v18  ;;  %v3793_v18 = vld [vmem:[%s5586_s8] ss:$0 sm:$0xff]  ;;  %s4715_s8 = smov 96  }
 0x67c   :  { %4363 = vmatpush3.msra.mxu0 %v5349_v21  ;;  %4397 = vmatprep.subr.mxu1 %v4711_v1 }
 0x67d   :  { %4364 = vmatprep.subr.mxu0 %v4711_v1  ;;  %4366 = vmatprep.mubr.msk.f32.mxu0 %vm4712_vm0, %v4711_v1 }
 0x67e   :  { %4365 = vmatpush3.msra.mxu0 %v5403_v32  ;;  %4398 = vmatpush3.msra.mxu1 %v5400_v31 }
 0x67f   :  { %4399 = vmatprep.mubr.msk.f32.mxu1 %vm4712_vm0, %v4711_v1  ;;  %4367 = vmatmul.mubr.f32.vlgmr.msra.gmra.mxu0 %v2774_v62 }
 0x680   :  { %4380 = vmatprep.subr.mxu0 %v4711_v1  ;;  %4400 = vmatmul.mubr.f32.vlgmr.msra.gmra.mxu1 %v2773_v61 }
 0x681   :  { %4381 = vmatpush3.msra.mxu0 %v2810_v20  ;;  %4388 = vmatprep.mubr.msk.f32.mxu0 %vm4712_vm0, %v4711_v1 }
 0x682   :  { %4382 = vmatprep.subr.mxu0 %v4711_v1  ;;  %4413 = vmatprep.subr.mxu1 %v4711_v1 }
 0x683   :  { %4383 = vmatpush3.msra.mxu0 %v2817_v22  ;;  %4421 = vmatprep.mubr.msk.f32.mxu1 %vm4712_vm0, %v4711_v1 }
 0x684   :  { %4384 = vmatprep.subr.mxu0 %v4711_v1 }
 0x685   :  { %4385 = vmatpush3.msra.mxu0 %v2824_v24 }
 0x686   :  { %4386 = vmatprep.subr.mxu0 %v4711_v1 }
 0x687   :  { %4387 = vmatpush3.msra.mxu0 %v2831_v33  ;;  %v3240_v33 = vld [vmem:[#allocation11 + $0x18] sm:$0xff] }
 0x688   :  { %4389 = vmatmul.mubr.f32.vlgmr.msra.gmra.mxu0 %v2773_v61  ;;  %4402 = vmatprep.subr.mxu0 %v4711_v1  ;;  %v5470_v37 = vand.u32 4294901760, %v3240_v33 }
 0x689   :  { %4410 = vmatprep.mubr.msk.f32.mxu0 %vm4712_vm0, %v4711_v1 }
 0x68a   :  { %v5477_v40 = vsub.f32 %v3240_v33, %v5470_v37  ;;  %4403 = vmatpush3.msra.mxu0 %v5470_v37 }
 0x68b   :  { %4404 = vmatprep.subr.mxu0 %v4711_v1 }
 0x68c   :  { %v3356_v45 = vand.u32 4294901760, %v5477_v40  ;;  %4405 = vmatpush3.msra.mxu0 %v5472_v38 }
 0x68d   :  { %4406 = vmatprep.subr.mxu0 %v4711_v1 }
 0x68e   :  { %v3357_v49 = vsub.f32 %v5477_v40, %v3356_v45  ;;  %4407 = vmatpush3.msra.mxu0 %v5474_v39 }
 0x68f   :  { %4408 = vmatprep.subr.mxu0 %v4711_v1 }
 0x690   :  { %v3358_v53 = vand.u32 4294901760, %v3357_v49  ;;  %4409 = vmatpush3.msra.mxu0 %v3284_v35 }
 0x691   :  { %4424 = vmatprep.subr.mxu0 %v4711_v1 }
 0x692   :  { %4414 = vmatpush3.msra.mxu1 %v3358_v53 }
 0x693   :  { %4415 = vmatprep.subr.mxu1 %v4711_v1 }
 0x694   :  { %4416 = vmatpush3.msra.mxu1 %v3365_v54 }
 0x695   :  { %4417 = vmatprep.subr.mxu1 %v4711_v1 }
 0x696   :  { %4418 = vmatpush3.msra.mxu1 %v3372_v55 }
 0x697   :  { %4419 = vmatprep.subr.mxu1 %v4711_v1 }
 0x72e   :  { %v2870_v2 = vpop.f32.mrf.mxu1 }
 0x730   :  { %v4357_v3 = vpop.f32.mrf.mxu1 }
 0x736   :  { %v3027_v4 = vpop.f32.mrf.mxu1 }
 0x737   :  { %v2779_v5 = vpop.f32.mrf.mxu0 }
 0x738   :  { %v4379_v6 = vpop.f32.mrf.mxu1  ;;  %v2780_v8 = vadd.f32 %v2779_v5, %v2699_v57  ;;  %v5508_v57 = vsub.f32 %v3237_v56, %v3284_v35 }
 0x739   :  { %v4346_v7 = vpop.f32.mrf.mxu0 }
 0x73a   :  { %v2871_v11 = vadd.f32 %v2870_v2, %v2780_v8 }
 0x73f   :  { %v2950_v9 = vpop.f32.mrf.mxu0 }
 0x740   :  { %v3185_v10 = vpop.f32.mrf.mxu1  ;;  %v2951_v14 = vadd.f32 %v2950_v9, %v2871_v11 }
 0x741   :  { %v4368_v12 = vpop.f32.mrf.mxu0 }
 0x742   :  { %v4401_v13 = vpop.f32.mrf.mxu1  ;;  %v3028_v15 = vadd.f32 %v3027_v4, %v2951_v14 }
 0x748   :  { %v3110_v16 = vpop.f32.mrf.mxu0 }
 0x749   :  { %v3111_v17 = vadd.f32 %v3110_v16, %v3028_v15 }
 0x74a   :  { %v4390_v19 = vpop.f32.mrf.mxu0 }
 0x74b   :  { %v3186_v20 = vadd.f32 %v3185_v10, %v3111_v17 }
 0x74d   :  { %v3196_v21 = vadd.f32 %v3793_v18, %v3186_v20 }
 0x74f   :  { %4502 = vtanh.f32 %v3196_v21  ;;  %v3794_v23 = vmul.f32 -1.442695, %v3196_v21 }
 0x751   :  { %4504 = vpow2.f32 %v3794_v23 }
 0x75c   :  { %v4503_v22 = vpop.eup %4502 }
 0x75d   :  { %3210 = vrot.lane.b32.xlu1 %v4503_v22, %s4714_s23 }
 0x75e   :  { %v4505_v24 = vpop.eup %4504 }
 0x75f   :  { %v3200_v25 = vadd.f32 1.0, %v4505_v24 }
 0x761   :  { %4506 = vrcp.f32 %v3200_v25 }
 0x76e   :  { %v4507_v26 = vpop.eup %4506 }
 0x76f   :  { %v3208_v30 = vmul.f32 %v4507_v26, %v3206_v29 }
 0x7cf   :  { %v3211_v27 = vpop.permute.xlu1 %3210 }
 0x7d0   :  { %v3213_v28 = vmul.f32 %v4507_v26, %v3211_v27 }
 0x7d2   :  { %3215 = vrot.lane.b32.xlu1 %v3213_v28, %s4713_s0 }
 0x844   :  { %v3216_v31 = vpop.permute.xlu1 %3215 }
 0x845   :  { %v3218_v32 = vadd.f32 %v3216_v31, %v3208_v30 }
 0x847   :  { %4508 = vtanh.f32 %v3218_v32 }
 0x854   :  { %v4509_v44 = vpop.eup %4508 }
 0x855   :  { %3221 = vrot.lane.b32.xlu0 %v4509_v44, %s4714_s23 }
 0x859   :  { %1163 = vrot.lane.b32.xlu0 %v5048_v52, %s4715_s8  ;;  %v3377_v52 = vand.u32 4294901760, %v5508_v57 }
 0x85b   :  { %v3378_v58 = vsub.f32 %v5508_v57, %v3377_v52 }
 0x85d   :  { %3232 = vrot.lane.b32.xlu0 %v3218_v32, %s4715_s8  ;;  %v3379_v59 = vand.u32 4294901760, %v3378_v58 }
 0x85f   :  { %4420 = vmatpush3.msra.mxu1 %v3379_v59 }
 0x860   :  { %4435 = vmatprep.subr.mxu1 %v4711_v1 }
 0x8c7   :  { %v3222_v60 = vpop.permute.xlu0 %3221 }
 0x8c8   :  { %v3224_v61 = vmul.f32 %v4507_v26, %v3222_v60 }
 0x8ca   :  { %3226 = vrot.lane.b32.xlu1 %v3224_v61, %s4713_s0 }
 0x8cb   :  { %v1164_v62 = vpop.permute.xlu0 %1163 }
 0x8cc   :  { %1166 = vst.msk [vmem:[#allocation16] sm:$0xff] %vm144_vm1, %v1164_v62 }
 0x8ce   :  { %2197 = vrot.lane.b32.xlu1 %v5261_v41, %s4715_s8 }
 0x8cf   :  { %v3233_v63 = vpop.permute.xlu0 %3232 }
 0x8d0   :  { %3236 = vst.msk [vmem:[#allocation16 + $0x10] sm:$0xff] %vm144_vm1, %v3233_v63 }
 0x93c   :  { %v3227_v0 = vpop.permute.xlu1 %3226 }
 0x93d   :  { %3230 = vst.msk [vmem:[#allocation14 + $0x10] sm:$0xff] %vm144_vm1, %v3227_v0  ;;  %v3248_v46 = vsel %vm144_vm1, %v3227_v0, 0 }
 0x93e   :  { %v3319_v2 = vand.u32 4294901760, %v3248_v46 }
 0x940   :  { %v3320_v3 = vsub.f32 %v3248_v46, %v3319_v2  ;;  %4422 = vmatmul.mubr.f32.vlgmr.msra.gmra.mxu1 %v3319_v2  ;;  %v2198_v4 = vpop.permute.xlu1 %2197 }
 0x941   :  { %4436 = vmatpush3.msra.mxu1 %v5470_v37  ;;  %2201 = vst.msk [vmem:[#allocation16 + $0x8] sm:$0xff] %vm144_vm1, %v2198_v4  ;;  %4443 = vmatprep.mubr.msk.f32.mxu1 %vm4712_vm0, %v4711_v1 }
 0x942   :  { %v3321_v41 = vand.u32 4294901760, %v3320_v3  ;;  %4437 = vmatprep.subr.mxu1 %v4711_v1 }
 0x943   :  { %4438 = vmatpush3.msra.mxu1 %v5472_v38 }
 0x944   :  { %v3322_v5 = vsub.f32 %v3320_v3, %v3321_v41  ;;  %4439 = vmatprep.subr.mxu1 %v4711_v1 }
 0x945   :  { %4440 = vmatpush3.msra.mxu1 %v5474_v39 }
 0x946   :  { %4441 = vmatprep.subr.mxu1 %v4711_v1  ;;  %v3323_v6 = vand.u32 4294901760, %v3322_v5 }
 0x947   :  { %4442 = vmatpush3.msra.mxu1 %v3284_v35 }
 0x948   :  { %4444 = vmatmul.mubr.f32.vlgmr.msra.gmra.mxu1 %v3321_v41  ;;  %4457 = vmatprep.subr.mxu1 %v4711_v1 }
 0x949   :  { %4411 = vmatmul.mubr.f32.vlgmr.msra.gmra.mxu0 %v3323_v6  ;;  %4458 = vmatpush3.msra.mxu1 %v5470_v37 }
 0x94a   :  { %4425 = vmatpush3.msra.mxu0 %v5477_v40  ;;  %4459 = vmatprep.subr.mxu1 %v4711_v1 }
 0x94b   :  { %4426 = vmatprep.subr.mxu0 %v4711_v1  ;;  %4460 = vmatpush3.msra.mxu1 %v5472_v38 }
 0x94c   :  { %4427 = vmatpush3.msra.mxu0 %v5480_v42  ;;  %4461 = vmatprep.subr.mxu1 %v4711_v1 }
 0x94d   :  { %4428 = vmatprep.subr.mxu0 %v4711_v1  ;;  %4462 = vmatpush3.msra.mxu1 %v5474_v39 }
 0x94e   :  { %4429 = vmatpush3.msra.mxu0 %v5483_v43  ;;  %4463 = vmatprep.subr.mxu1 %v4711_v1 }
 0x94f   :  { %4430 = vmatprep.subr.mxu0 %v4711_v1  ;;  %4432 = vmatprep.mubr.msk.f32.mxu0 %vm4712_vm0, %v4711_v1 }
 0x950   :  { %4431 = vmatpush3.msra.mxu0 %v5508_v57  ;;  %4464 = vmatpush3.msra.mxu1 %v3284_v35 }
 0x951   :  { %4465 = vmatprep.mubr.msk.f32.mxu1 %vm4712_vm0, %v4711_v1  ;;  %4433 = vmatmul.mubr.f32.vlgmr.msra.gmra.mxu0 %v3320_v3 }
 0x952   :  { %4446 = vmatprep.subr.mxu0 %v4711_v1  ;;  %4466 = vmatmul.mubr.f32.vlgmr.msra.gmra.mxu1 %v3319_v2 }
 0x953   :  { %4447 = vmatpush3.msra.mxu0 %v3356_v45  ;;  %4454 = vmatprep.mubr.msk.f32.mxu0 %vm4712_vm0, %v4711_v1 }
 0x954   :  { %4448 = vmatprep.subr.mxu0 %v4711_v1 }
 0x955   :  { %4449 = vmatpush3.msra.mxu0 %v3363_v47 }
 0x956   :  { %4450 = vmatprep.subr.mxu0 %v4711_v1 }
 0x957   :  { %4451 = vmatpush3.msra.mxu0 %v3370_v48 }
 0x958   :  { %4452 = vmatprep.subr.mxu0 %v4711_v1 }
 0x959   :  { %4453 = vmatpush3.msra.mxu0 %v3377_v52 }
 0x95a   :  { %4455 = vmatmul.mubr.f32.vlgmr.msra.gmra.mxu0 %v3319_v2 }
 0x95b   :  { %4641 = shalt.err (!%p4638_p6)
}
 0x95c   :  { %3757 = dma.vmem_to_hbm [thread:$0]  %s3752_s5, 384, %s5590_s12, [#allocation15], %s4704_s30, %s4704_s30, %s4705_s14  }
 0x95d   :  { %s4717_s29 = smov [#allocation16]  }
 0x95e   :  { %s3763_s15 = sshll.u32 %s4717_s29, 4  ;;  %s3764_s15 = int_to_ptr.vmem [resolvable:$true] %s3763_s15 }
 0x95f   :  { %s4650_s16 = scalar_lea.vmem %s3764_s15, 384  ;;  %p4655_p8 = scmp.lt.s32.totalorder %s3764_s15, %s3764_s15 }
 0x960   :  { %p4651_p7 = scmp.ne.s32.totalorder %s3764_s15, %s4650_s16  ;;  %p4656_p9 = scmp.lt.s32.totalorder %s4650_s16, %s4650_s16 }
 0x962   :  { %p4657_p10 = por %p4656_p9, %p4655_p8 }
 0x964   :  { %p4658_p11 = pnand %p4657_p10, %p4651_p7 }
 0x966   :  { %4661 = shalt.err (!%p4658_p11)
}
 0x967   :  { %3769 = dma.vmem_to_hbm [thread:$0]  %s3764_s15, 384, %s5591_s13, [#allocation15], %s4704_s30, %s4704_s30, %s4705_s14  }
 0x968   :  { %v3795_v12 = vld [vmem:[%s5588_s10] ss:$0 sm:$0xff]  ;;  %s4718_s13 = smov [#allocation13]  }
 0x969   :  { %s3742_s30 = sshll.u32 %s4718_s13, 4  ;;  %s3743_s30 = int_to_ptr.vmem [resolvable:$true] %s3742_s30 }
 0x96a   :  { %s4670_s14 = scalar_lea.vmem %s3743_s30, 128  ;;  %p4675_p13 = scmp.lt.s32.totalorder %s3743_s30, %s3743_s30 }
 0x96b   :  { %p4671_p12 = scmp.ne.s32.totalorder %s3743_s30, %s4670_s14  ;;  %p4676_p0 = scmp.lt.s32.totalorder %s4670_s14, %s4670_s14 }
 0x96d   :  { %p4677_p1 = por %p4676_p0, %p4675_p13 }
 0x96f   :  { %p4678_p2 = pnand %p4677_p1, %p4671_p12 }
 0xa00   :  { %v3416_v1 = vpop.f32.mrf.mxu1 }
 0xa02   :  { %v4423_v7 = vpop.f32.mrf.mxu1 }
 0xa08   :  { %v3573_v8 = vpop.f32.mrf.mxu1 }
 0xa09   :  { %v3325_v9 = vpop.f32.mrf.mxu0 }
 0xa0a   :  { %v4445_v10 = vpop.f32.mrf.mxu1  ;;  %v3326_v13 = vadd.f32 %v3795_v12, %v3325_v9 }
 0xa0b   :  { %v4412_v11 = vpop.f32.mrf.mxu0 }
 0xa0c   :  { %v3417_v16 = vadd.f32 %v3416_v1, %v3326_v13 }
 0xa11   :  { %v3496_v14 = vpop.f32.mrf.mxu0 }
 0xa12   :  { %v3731_v15 = vpop.f32.mrf.mxu1  ;;  %v3497_v19 = vadd.f32 %v3496_v14, %v3417_v16 }
 0xa13   :  { %v4434_v17 = vpop.f32.mrf.mxu0 }
 0xa14   :  { %v4467_v18 = vpop.f32.mrf.mxu1  ;;  %v3574_v20 = vadd.f32 %v3573_v8, %v3497_v19 }
 0xa1a   :  { %v3656_v21 = vpop.f32.mrf.mxu0 }
 0xa1b   :  { %v3657_v22 = vadd.f32 %v3656_v21, %v3574_v20 }
 0xa1c   :  { %v4456_v23 = vpop.f32.mrf.mxu0 }
 0xa1d   :  { %v3732_v24 = vadd.f32 %v3731_v15, %v3657_v22 }
 0xa1f   :  { %3735 = vst.msk [vmem:[#allocation13] sm:$0xff] %vm144_vm1, %v3732_v24 }
 0xa20   :  { %4681 = shalt.err (!%p4678_p2)
}
 0xa21   :  { %3745 = dma.vmem_to_hbm [thread:$0]  %s3743_s30, 128, %s5589_s11, [#allocation4]  }
 0xa22   :  { %4698 = dma.done.wait [#allocation4], 128  }
 0xa23   :  { %4699 = vsyncadd [#allocation4], 4294967168 }
 0xa24   :  { %4700 = dma.done.wait [#allocation15], 768  }
 0xa25   :  { %4701 = vsyncadd [#allocation15], 4294966528 }
 0xa26   :  { %3779 = vsyncpa [#allocation3], 1 }
 0xa27   :  { %3780 = vsyncpa [#allocation6], 1 }
 0xa28   :  { %3781 = vsyncpa [#allocation9], 1 }
 0xa29   :  { %3782 = vsyncpa [#allocation12], 1 }
 0xa2a   :  { %3783 = vsyncpa [#allocation4], 1 }
 0xa2b   :  { %3784 = vsyncpa [#allocation15], 1 }

</bundles_post_ra>
